<compile_context>
chip_gen: v7x
topology: tpu7x:2x2x1
jax: 0.10.0
libtpu: 0.0.40
codegen_flags: <defaults>
</compile_context>

<pallas_src>
import math

import jax
import jax.numpy as jnp
from jax import lax
from jax.experimental import pallas as pl
from jax.experimental.pallas import tpu as pltpu

H = 64          # hidden size
L = 32          # num LSTM layers
IN = 4          # raw input feature size
OUT = 4         # fc output size


# ---------------------------------------------------------------------------
# Pallas kernel: single grid step; layer loop + time loop run inside the kernel.
# seq_buf (T*B, H) holds the current layer's input sequence (time-major, flattened)
# and is overwritten in place with that layer's output sequence.
# gx_buf  (T*B, 4H) holds the hoisted input projection (+ bias) for the current layer.
# ---------------------------------------------------------------------------
def lstm_stack_kernel(x_hbm, len_ref, w_ih_ref, w_hh_ref, b_ref, fcw_ref,
                      fcb_ref, out_ref, seq_buf, gx_buf, hfin_buf, dma_sem):
    TB = seq_buf.shape[0]
    B = hfin_buf.shape[0]
    T = TB // B
    unroll_time = T <= 32

    # Bring the (already padded, time-major, flattened) input sequence into VMEM once.
    cp = pltpu.make_async_copy(x_hbm, seq_buf, dma_sem)
    cp.start()
    cp.wait()

    len_col = len_ref[...]                      # (B, 1) int32
    hfin_buf[...] = jnp.zeros_like(hfin_buf)

    def run_layer(layer, capture):
        w_ih = w_ih_ref[layer]                  # (H, 4H) bf16
        w_hh = w_hh_ref[layer]                  # (H, 4H) bf16
        bias = b_ref[layer]                     # (1, 4H) f32

        # Hoisted input projection + bias: one big MXU matmul off the serial chain.
        gx_buf[...] = (jnp.dot(seq_buf[...].astype(jnp.bfloat16), w_ih,
                               preferred_element_type=jnp.float32) + bias)

        def step(t, carry):
            h, c = carry                        # f32 (B, H)
            row = t * B
            gates = (jnp.dot(h.astype(jnp.bfloat16), w_hh,
                             preferred_element_type=jnp.float32)
                     + gx_buf[pl.ds(row, B), :])            # (B, 4H) f32
            # i and f share one lane-aligned 128-lane sigmoid (PyTorch order i,f,g,o)
            if_act = jax.nn.sigmoid(gates[:, :2 * H])
            i_g = if_act[:, :H]
            f_g = if_act[:, H:]
            g_g = jnp.tanh(gates[:, 2 * H:3 * H])
            o_g = jax.nn.sigmoid(gates[:, 3 * H:])
            c_new = f_g * c + i_g * g_g
            h_new = o_g * jnp.tanh(c_new)
            if capture:
                # last layer only: grab h at the last valid timestep of each sequence
                mask = len_col == (t + 1)
                hfin_buf[...] = jnp.where(mask, h_new, hfin_buf[...])
            else:
                # this layer's output sequence is the next layer's input
                seq_buf[pl.ds(row, B), :] = h_new.astype(seq_buf.dtype)
            return h_new, c_new

        z = jnp.zeros((B, H), jnp.float32)
        lax.fori_loop(0, T, step, (z, z), unroll=unroll_time)

    # Layers 0 .. L-2: write output sequence back, no capture cost.
    def layer_body(layer, carry):
        run_layer(layer, capture=False)
        return carry

    lax.fori_loop(0, L - 1, layer_body, 0)

    # Peeled last layer: only the length-masked final-hidden capture.
    run_layer(L - 1, capture=True)

    # fc(h_n[-1])
    out_ref[...] = (jnp.dot(hfin_buf[...], fcw_ref[...],
                            preferred_element_type=jnp.float32) + fcb_ref[...])


# ---------------------------------------------------------------------------
# Wrapper
# ---------------------------------------------------------------------------
def trajectory_predictor(x, lengths, params):
    """x: (B, T, IN) float32, lengths: (B,) int32 in [1, T] -> (B, 4)."""
    w_ih, w_hh, b, fcw, fcb = params
    B, T, in_dim = x.shape
    assert in_dim == IN

    # glue: to time-major, pad features 4 -> 64 with zeros, flatten (T, B) -> T*B rows
    x_tm = jnp.transpose(x, (1, 0, 2)).astype(jnp.float32)          # (T, B, IN)
    x_tm = jnp.pad(x_tm, ((0, 0), (0, 0), (0, H - IN)))             # (T, B, H)
    x_flat = x_tm.reshape(T * B, H)                                 # (T*B, H)
    len2d = lengths.reshape(B, 1).astype(jnp.int32)                 # (B, 1)

    # bf16 matmul operands, f32 accumulation / state / bias
    w_ih_bf = w_ih.astype(jnp.bfloat16)                             # (L, H, 4H)
    w_hh_bf = w_hh.astype(jnp.bfloat16)                             # (L, H, 4H)

    # TODO(synk): for large B on v7x add a leading 'parallel' batch grid axis (2 shards)
    # to use both TensorCores, and for large T chunk the time axis + set vmem_limit_bytes.
    grid_spec = pltpu.PrefetchScalarGridSpec(
        num_scalar_prefetch=0,
        grid=(1,),
        in_specs=[
            pl.BlockSpec(memory_space=pl.ANY),                   # x: stays in HBM, DMA'd
            pl.BlockSpec((B, 1), lambda i: (0, 0)),              # lengths
            pl.BlockSpec((L, H, 4 * H), lambda i: (0, 0, 0)),    # W_ih, all layers (bf16)
            pl.BlockSpec((L, H, 4 * H), lambda i: (0, 0, 0)),    # W_hh, all layers (bf16)
            pl.BlockSpec((L, 1, 4 * H), lambda i: (0, 0, 0)),    # bias, all layers (f32)
            pl.BlockSpec((H, OUT), lambda i: (0, 0)),            # fc weight
            pl.BlockSpec((1, OUT), lambda i: (0, 0)),            # fc bias
        ],
        out_specs=pl.BlockSpec((B, OUT), lambda i: (0, 0)),
        scratch_shapes=[
            pltpu.VMEM((T * B, H), jnp.float32),        # seq_buf: layer in/out sequence
            pltpu.VMEM((T * B, 4 * H), jnp.float32),    # gx_buf: hoisted input projection
            pltpu.VMEM((B, H), jnp.float32),            # hfin: h at t = length-1
            pltpu.SemaphoreType.DMA,                    # input DMA semaphore
        ],
    )

    return pl.pallas_call(
        lstm_stack_kernel,
        out_shape=jax.ShapeDtypeStruct((B, OUT), jnp.float32),
        grid_spec=grid_spec,
        compiler_params=pltpu.CompilerParams(
            dimension_semantics=("arbitrary",)),
    )(x_flat, len2d, w_ih_bf, w_hh_bf, b, fcw, fcb)


# ---------------------------------------------------------------------------
# Deterministic parameter init (mimics PyTorch's U(-1/sqrt(H), 1/sqrt(H)))
# ---------------------------------------------------------------------------
def init_params(key):
    std = 1.0 / math.sqrt(H)
    keys = jax.random.split(key, 4 * L + 2)
    w_ih_list, w_hh_list, b_list = [], [], []
    for layer in range(L):
        in_dim = IN if layer == 0 else H
        kw1, kw2, kb1, kb2 = keys[4 * layer:4 * layer + 4]
        w_ih = jax.random.uniform(kw1, (4 * H, in_dim), jnp.float32, -std, std)
        w_hh = jax.random.uniform(kw2, (4 * H, H), jnp.float32, -std, std)
        b_ih = jax.random.uniform(kb1, (4 * H,), jnp.float32, -std, std)
        b_hh = jax.random.uniform(kb2, (4 * H,), jnp.float32, -std, std)
        w_ih_t = w_ih.T                                      # (in_dim, 4H)
        if layer == 0:
            w_ih_t = jnp.pad(w_ih_t, ((0, H - IN), (0, 0)))  # zero-pad to (H, 4H)
        w_ih_list.append(w_ih_t)
        w_hh_list.append(w_hh.T)
        b_list.append((b_ih + b_hh)[None, :])
    w_ih_all = jnp.stack(w_ih_list)        # (L, H, 4H)
    w_hh_all = jnp.stack(w_hh_list)        # (L, H, 4H)
    b_all = jnp.stack(b_list)              # (L, 1, 4H)

    fc_std = 1.0 / math.sqrt(H)
    fcw = jax.random.uniform(keys[4 * L], (OUT, H), jnp.float32,
                             -fc_std, fc_std).T              # (H, OUT)
    fcb = jax.random.uniform(keys[4 * L + 1], (1, OUT), jnp.float32,
                             -fc_std, fc_std)                # (1, OUT)
    return w_ih_all, w_hh_all, b_all, fcw, fcb


# ---------------------------------------------------------------------------
# Pure-JAX f32 reference (module semantics) for the correctness check
# ---------------------------------------------------------------------------
def reference(x, lengths, params):
    w_ih, w_hh, b, fcw, fcb = params
    B, T, _ = x.shape
    seq = jnp.pad(jnp.transpose(x, (1, 0, 2)).astype(jnp.float32),
                  ((0, 0), (0, 0), (0, H - IN)))             # (T, B, H)
    for layer in range(L):
        def cell(carry, x_t, layer=layer):
            h, c = carry
            gates = x_t @ w_ih[layer] + h @ w_hh[layer] + b[layer]
            i_g = jax.nn.sigmoid(gates[:, 0 * H:1 * H])
            f_g = jax.nn.sigmoid(gates[:, 1 * H:2 * H])
            g_g = jnp.tanh(gates[:, 2 * H:3 * H])
            o_g = jax.nn.sigmoid(gates[:, 3 * H:4 * H])
            c = f_g * c + i_g * g_g
            h = o_g * jnp.tanh(c)
            return (h, c), h
        (_, _), seq = lax.scan(
            cell, (jnp.zeros((B, H), jnp.float32),
                   jnp.zeros((B, H), jnp.float32)), seq)
    h_final = seq[lengths - 1, jnp.arange(B)]                # (B, H)
    return h_final @ fcw + fcb


if __name__ == "__main__":
    key = jax.random.PRNGKey(0)
    k_param, k_x = jax.random.split(key)

    B, T = 8, 8
    params = init_params(k_param)
    x = jax.random.normal(k_x, (B, T, IN), jnp.float32)
    lengths = jnp.array([8, 5, 3, 8, 1, 7, 2, 6], jnp.int32)   # each in [1, T]

    out = jax.block_until_ready(trajectory_predictor(x, lengths, params))
    assert out.shape == (B, OUT), out.shape

    ref = jax.block_until_ready(reference(x, lengths, params))
    assert jnp.allclose(out, ref, atol=2e-2, rtol=2e-2), (out, ref)

    print("KERNEL_OK")
</pallas_src>

<mosaic_0001>
module attributes {stable_mosaic.version = 11 : i64} {
  func.func @lstm_stack_kernel(%arg0: i32, %arg1: memref<64x64xf32, #tpu.memory_space<any>>, %arg2: memref<8x1xi32, #tpu.memory_space<vmem>>, %arg3: memref<32x64x256xbf16, #tpu.memory_space<vmem>>, %arg4: memref<32x64x256xbf16, #tpu.memory_space<vmem>>, %arg5: memref<32x1x256xf32, #tpu.memory_space<vmem>>, %arg6: memref<64x4xf32, #tpu.memory_space<vmem>>, %arg7: memref<1x4xf32, #tpu.memory_space<vmem>>, %arg8: memref<8x4xf32, #tpu.memory_space<vmem>>, %arg9: memref<64x64xf32, #tpu.memory_space<vmem>>, %arg10: memref<64x256xf32, #tpu.memory_space<vmem>>, %arg11: memref<8x64xf32, #tpu.memory_space<vmem>>, %arg12: memref<!tpu.dma_semaphore, #tpu.memory_space<semaphore_mem>>) attributes {dimension_semantics = [#tpu.dimension_semantics<arbitrary>], iteration_bounds = array<i64: 1>, scalar_prefetch = 0 : i64, scratch_operands = 4 : i64, tpu.core_type = #tpu.core_type<tc>, window_params = [{}, {pipeline_mode = #tpu.pipeline_mode<synchronous>, transform_indices = @transform_1, window_bounds = array<i64: 8, 1>}, {pipeline_mode = #tpu.pipeline_mode<synchronous>, transform_indices = @transform_2, window_bounds = array<i64: 32, 64, 256>}, {pipeline_mode = #tpu.pipeline_mode<synchronous>, transform_indices = @transform_3, window_bounds = array<i64: 32, 64, 256>}, {pipeline_mode = #tpu.pipeline_mode<synchronous>, transform_indices = @transform_4, window_bounds = array<i64: 32, 1, 256>}, {pipeline_mode = #tpu.pipeline_mode<synchronous>, transform_indices = @transform_5, window_bounds = array<i64: 64, 4>}, {pipeline_mode = #tpu.pipeline_mode<synchronous>, transform_indices = @transform_6, window_bounds = array<i64: 1, 4>}, {pipeline_mode = #tpu.pipeline_mode<synchronous>, transform_indices = @transform_7, window_bounds = array<i64: 8, 4>}]} {
    tpu.enqueue_dma source(%arg1 : memref<64x64xf32, #tpu.memory_space<any>>) target(%arg9 : memref<64x64xf32, #tpu.memory_space<vmem>>) target_semaphore(%arg12 : memref<!tpu.dma_semaphore, #tpu.memory_space<semaphore_mem>>)
    tpu.wait_dma2 semaphore(%arg12 : memref<!tpu.dma_semaphore, #tpu.memory_space<semaphore_mem>>) src(%arg1 : memref<64x64xf32, #tpu.memory_space<any>>) dst(%arg9 : memref<64x64xf32, #tpu.memory_space<vmem>>)
    %c0 = arith.constant 0 : index
    %c0_0 = arith.constant 0 : index
    %0 = vector.load %arg2[%c0, %c0_0] : memref<8x1xi32, #tpu.memory_space<vmem>>, vector<8x1xi32>
    %cst = arith.constant 0.000000e+00 : f32
    %1 = vector.broadcast %cst : f32 to vector<8x64xf32>
    %c0_1 = arith.constant 0 : index
    %c0_2 = arith.constant 0 : index
    %2 = vector.load %arg11[%c0_1, %c0_2] : memref<8x64xf32, #tpu.memory_space<vmem>>, vector<8x64xf32>
    tpu.vector_store %arg11[%c0_1, %c0_2], %1 {strides = array<i32>} : memref<8x64xf32, #tpu.memory_space<vmem>>, vector<8x64xf32>,
    %c0_i32 = arith.constant 0 : i32
    %c31_i32 = arith.constant 31 : i32
    %3 = arith.addi %c0_i32, %c31_i32 : i32
    %c1_i32 = arith.constant 1 : i32
    scf.for %arg13 = %c0_i32 to %3 step %c1_i32  : i32 {
      %304 = arith.index_cast %arg13 : i32 to index
      %c0_109 = arith.constant 0 : index
      %c0_110 = arith.constant 0 : index
      %305 = vector.load %arg3[%304, %c0_109, %c0_110] : memref<32x64x256xbf16, #tpu.memory_space<vmem>>, vector<1x64x256xbf16>
      %306 = vector.shape_cast %305 : vector<1x64x256xbf16> to vector<64x256xbf16>
      %307 = arith.index_cast %arg13 : i32 to index
      %c0_111 = arith.constant 0 : index
      %c0_112 = arith.constant 0 : index
      %308 = vector.load %arg4[%307, %c0_111, %c0_112] : memref<32x64x256xbf16, #tpu.memory_space<vmem>>, vector<1x64x256xbf16>
      %309 = vector.shape_cast %308 : vector<1x64x256xbf16> to vector<64x256xbf16>
      %310 = arith.index_cast %arg13 : i32 to index
      %c0_113 = arith.constant 0 : index
      %c0_114 = arith.constant 0 : index
      %311 = vector.load %arg5[%310, %c0_113, %c0_114] : memref<32x1x256xf32, #tpu.memory_space<vmem>>, vector<1x1x256xf32>
      %312 = vector.shape_cast %311 : vector<1x1x256xf32> to vector<1x256xf32>
      %c0_115 = arith.constant 0 : index
      %c0_116 = arith.constant 0 : index
      %313 = vector.load %arg9[%c0_115, %c0_116] : memref<64x64xf32, #tpu.memory_space<vmem>>, vector<64x64xf32>
      %314 = arith.truncf %313 : vector<64x64xf32> to vector<64x64xbf16>
      %cst_117 = arith.constant dense<0.000000e+00> : vector<64x256xf32>
      %315 = tpu.matmul %314, %306, %cst_117 {dimension_numbers = #tpu.dot_dimension_numbers<[1], [0], [0], [1], [0, 0, 1, 1], [], []>} : vector<64x64xbf16>, vector<64x256xbf16>, vector<64x256xf32> -> vector<64x256xf32>
      %316 = vector.broadcast %312 : vector<1x256xf32> to vector<64x256xf32>
      %317 = arith.addf %315, %316 : vector<64x256xf32>
      %c0_118 = arith.constant 0 : index
      %c0_119 = arith.constant 0 : index
      %318 = vector.load %arg10[%c0_118, %c0_119] : memref<64x256xf32, #tpu.memory_space<vmem>>, vector<64x256xf32>
      tpu.vector_store %arg10[%c0_118, %c0_119], %317 {strides = array<i32>} : memref<64x256xf32, #tpu.memory_space<vmem>>, vector<64x256xf32>,
      %cst_120 = arith.constant 0.000000e+00 : f32
      %319 = vector.broadcast %cst_120 : f32 to vector<8x64xf32>
      %c0_i32_121 = arith.constant 0 : i32
      %c8_i32_122 = arith.constant 8 : i32
      %320 = arith.muli %c0_i32_121, %c8_i32_122 : i32
      %321 = arith.truncf %319 : vector<8x64xf32> to vector<8x64xbf16>
      %cst_123 = arith.constant dense<0.000000e+00> : vector<8x256xf32>
      %322 = tpu.matmul %321, %309, %cst_123 {dimension_numbers = #tpu.dot_dimension_numbers<[1], [0], [0], [1], [0, 0, 1, 1], [], []>} : vector<8x64xbf16>, vector<64x256xbf16>, vector<8x256xf32> -> vector<8x256xf32>
      %323 = arith.index_cast %320 : i32 to index
      %c0_124 = arith.constant 0 : index
      %324 = vector.load %arg10[%323, %c0_124] : memref<64x256xf32, #tpu.memory_space<vmem>>, vector<8x256xf32>
      %325 = arith.addf %322, %324 : vector<8x256xf32>
      %326 = vector.extract_strided_slice %325 {offsets = [0, 0], sizes = [8, 128], strides = [1, 1]} : vector<8x256xf32> to vector<8x128xf32>
      %327 = arith.negf %326 : vector<8x128xf32>
      %328 = math.exp %327 : vector<8x128xf32>
      %cst_125 = arith.constant 1.000000e+00 : f32
      %329 = vector.broadcast %cst_125 : f32 to vector<8x128xf32>
      %330 = arith.addf %329, %328 : vector<8x128xf32>
      %331 = arith.divf %329, %330 : vector<8x128xf32>
      %332 = vector.extract_strided_slice %331 {offsets = [0, 0], sizes = [8, 64], strides = [1, 1]} : vector<8x128xf32> to vector<8x64xf32>
      %333 = vector.extract_strided_slice %331 {offsets = [0, 64], sizes = [8, 64], strides = [1, 1]} : vector<8x128xf32> to vector<8x64xf32>
      %334 = vector.extract_strided_slice %325 {offsets = [0, 128], sizes = [8, 64], strides = [1, 1]} : vector<8x256xf32> to vector<8x64xf32>
      %335 = math.tanh %334 : vector<8x64xf32>
      %336 = vector.extract_strided_slice %325 {offsets = [0, 192], sizes = [8, 64], strides = [1, 1]} : vector<8x256xf32> to vector<8x64xf32>
      %337 = arith.negf %336 : vector<8x64xf32>
      %338 = math.exp %337 : vector<8x64xf32>
      %cst_126 = arith.constant 1.000000e+00 : f32
      %339 = vector.broadcast %cst_126 : f32 to vector<8x64xf32>
      %340 = arith.addf %339, %338 : vector<8x64xf32>
      %341 = arith.divf %339, %340 : vector<8x64xf32>
      %342 = arith.mulf %333, %319 : vector<8x64xf32>
      %343 = arith.mulf %332, %335 : vector<8x64xf32>
      %344 = arith.addf %342, %343 : vector<8x64xf32>
      %345 = math.tanh %344 : vector<8x64xf32>
      %346 = arith.mulf %341, %345 : vector<8x64xf32>
      %347 = arith.index_cast %320 : i32 to index
      %c0_127 = arith.constant 0 : index
      %348 = vector.load %arg9[%347, %c0_127] : memref<64x64xf32, #tpu.memory_space<vmem>>, vector<8x64xf32>
      tpu.vector_store %arg9[%347, %c0_127], %346 {strides = array<i32>} : memref<64x64xf32, #tpu.memory_space<vmem>>, vector<8x64xf32>,
      %c1_i32_128 = arith.constant 1 : i32
      %c8_i32_129 = arith.constant 8 : i32
      %349 = arith.muli %c1_i32_128, %c8_i32_129 : i32
      %350 = arith.truncf %346 : vector<8x64xf32> to vector<8x64xbf16>
      %cst_130 = arith.constant dense<0.000000e+00> : vector<8x256xf32>
      %351 = tpu.matmul %350, %309, %cst_130 {dimension_numbers = #tpu.dot_dimension_numbers<[1], [0], [0], [1], [0, 0, 1, 1], [], []>} : vector<8x64xbf16>, vector<64x256xbf16>, vector<8x256xf32> -> vector<8x256xf32>
      %352 = arith.index_cast %349 : i32 to index
      %c0_131 = arith.constant 0 : index
      %353 = vector.load %arg10[%352, %c0_131] : memref<64x256xf32, #tpu.memory_space<vmem>>, vector<8x256xf32>
      %354 = arith.addf %351, %353 : vector<8x256xf32>
      %355 = vector.extract_strided_slice %354 {offsets = [0, 0], sizes = [8, 128], strides = [1, 1]} : vector<8x256xf32> to vector<8x128xf32>
      %356 = arith.negf %355 : vector<8x128xf32>
      %357 = math.exp %356 : vector<8x128xf32>
      %cst_132 = arith.constant 1.000000e+00 : f32
      %358 = vector.broadcast %cst_132 : f32 to vector<8x128xf32>
      %359 = arith.addf %358, %357 : vector<8x128xf32>
      %360 = arith.divf %358, %359 : vector<8x128xf32>
      %361 = vector.extract_strided_slice %360 {offsets = [0, 0], sizes = [8, 64], strides = [1, 1]} : vector<8x128xf32> to vector<8x64xf32>
      %362 = vector.extract_strided_slice %360 {offsets = [0, 64], sizes = [8, 64], strides = [1, 1]} : vector<8x128xf32> to vector<8x64xf32>
      %363 = vector.extract_strided_slice %354 {offsets = [0, 128], sizes = [8, 64], strides = [1, 1]} : vector<8x256xf32> to vector<8x64xf32>
      %364 = math.tanh %363 : vector<8x64xf32>
      %365 = vector.extract_strided_slice %354 {offsets = [0, 192], sizes = [8, 64], strides = [1, 1]} : vector<8x256xf32> to vector<8x64xf32>
      %366 = arith.negf %365 : vector<8x64xf32>
      %367 = math.exp %366 : vector<8x64xf32>
      %cst_133 = arith.constant 1.000000e+00 : f32
      %368 = vector.broadcast %cst_133 : f32 to vector<8x64xf32>
      %369 = arith.addf %368, %367 : vector<8x64xf32>
      %370 = arith.divf %368, %369 : vector<8x64xf32>
      %371 = arith.mulf %362, %344 : vector<8x64xf32>
      %372 = arith.mulf %361, %364 : vector<8x64xf32>
      %373 = arith.addf %371, %372 : vector<8x64xf32>
      %374 = math.tanh %373 : vector<8x64xf32>
      %375 = arith.mulf %370, %374 : vector<8x64xf32>
      %376 = arith.index_cast %349 : i32 to index
      %c0_134 = arith.constant 0 : index
      %377 = vector.load %arg9[%376, %c0_134] : memref<64x64xf32, #tpu.memory_space<vmem>>, vector<8x64xf32>
      tpu.vector_store %arg9[%376, %c0_134], %375 {strides = array<i32>} : memref<64x64xf32, #tpu.memory_space<vmem>>, vector<8x64xf32>,
      %c2_i32_135 = arith.constant 2 : i32
      %c8_i32_136 = arith.constant 8 : i32
      %378 = arith.muli %c2_i32_135, %c8_i32_136 : i32
      %379 = arith.truncf %375 : vector<8x64xf32> to vector<8x64xbf16>
      %cst_137 = arith.constant dense<0.000000e+00> : vector<8x256xf32>
      %380 = tpu.matmul %379, %309, %cst_137 {dimension_numbers = #tpu.dot_dimension_numbers<[1], [0], [0], [1], [0, 0, 1, 1], [], []>} : vector<8x64xbf16>, vector<64x256xbf16>, vector<8x256xf32> -> vector<8x256xf32>
      %381 = arith.index_cast %378 : i32 to index
      %c0_138 = arith.constant 0 : index
      %382 = vector.load %arg10[%381, %c0_138] : memref<64x256xf32, #tpu.memory_space<vmem>>, vector<8x256xf32>
      %383 = arith.addf %380, %382 : vector<8x256xf32>
      %384 = vector.extract_strided_slice %383 {offsets = [0, 0], sizes = [8, 128], strides = [1, 1]} : vector<8x256xf32> to vector<8x128xf32>
      %385 = arith.negf %384 : vector<8x128xf32>
      %386 = math.exp %385 : vector<8x128xf32>
      %cst_139 = arith.constant 1.000000e+00 : f32
      %387 = vector.broadcast %cst_139 : f32 to vector<8x128xf32>
      %388 = arith.addf %387, %386 : vector<8x128xf32>
      %389 = arith.divf %387, %388 : vector<8x128xf32>
      %390 = vector.extract_strided_slice %389 {offsets = [0, 0], sizes = [8, 64], strides = [1, 1]} : vector<8x128xf32> to vector<8x64xf32>
      %391 = vector.extract_strided_slice %389 {offsets = [0, 64], sizes = [8, 64], strides = [1, 1]} : vector<8x128xf32> to vector<8x64xf32>
      %392 = vector.extract_strided_slice %383 {offsets = [0, 128], sizes = [8, 64], strides = [1, 1]} : vector<8x256xf32> to vector<8x64xf32>
      %393 = math.tanh %392 : vector<8x64xf32>
      %394 = vector.extract_strided_slice %383 {offsets = [0, 192], sizes = [8, 64], strides = [1, 1]} : vector<8x256xf32> to vector<8x64xf32>
      %395 = arith.negf %394 : vector<8x64xf32>
      %396 = math.exp %395 : vector<8x64xf32>
      %cst_140 = arith.constant 1.000000e+00 : f32
      %397 = vector.broadcast %cst_140 : f32 to vector<8x64xf32>
      %398 = arith.addf %397, %396 : vector<8x64xf32>
      %399 = arith.divf %397, %398 : vector<8x64xf32>
      %400 = arith.mulf %391, %373 : vector<8x64xf32>
      %401 = arith.mulf %390, %393 : vector<8x64xf32>
      %402 = arith.addf %400, %401 : vector<8x64xf32>
      %403 = math.tanh %402 : vector<8x64xf32>
      %404 = arith.mulf %399, %403 : vector<8x64xf32>
      %405 = arith.index_cast %378 : i32 to index
      %c0_141 = arith.constant 0 : index
      %406 = vector.load %arg9[%405, %c0_141] : memref<64x64xf32, #tpu.memory_space<vmem>>, vector<8x64xf32>
      tpu.vector_store %arg9[%405, %c0_141], %404 {strides = array<i32>} : memref<64x64xf32, #tpu.memory_space<vmem>>, vector<8x64xf32>,
      %c3_i32_142 = arith.constant 3 : i32
      %c8_i32_143 = arith.constant 8 : i32
      %407 = arith.muli %c3_i32_142, %c8_i32_143 : i32
      %408 = arith.truncf %404 : vector<8x64xf32> to vector<8x64xbf16>
      %cst_144 = arith.constant dense<0.000000e+00> : vector<8x256xf32>
      %409 = tpu.matmul %408, %309, %cst_144 {dimension_numbers = #tpu.dot_dimension_numbers<[1], [0], [0], [1], [0, 0, 1, 1], [], []>} : vector<8x64xbf16>, vector<64x256xbf16>, vector<8x256xf32> -> vector<8x256xf32>
      %410 = arith.index_cast %407 : i32 to index
      %c0_145 = arith.constant 0 : index
      %411 = vector.load %arg10[%410, %c0_145] : memref<64x256xf32, #tpu.memory_space<vmem>>, vector<8x256xf32>
      %412 = arith.addf %409, %411 : vector<8x256xf32>
      %413 = vector.extract_strided_slice %412 {offsets = [0, 0], sizes = [8, 128], strides = [1, 1]} : vector<8x256xf32> to vector<8x128xf32>
      %414 = arith.negf %413 : vector<8x128xf32>
      %415 = math.exp %414 : vector<8x128xf32>
      %cst_146 = arith.constant 1.000000e+00 : f32
      %416 = vector.broadcast %cst_146 : f32 to vector<8x128xf32>
      %417 = arith.addf %416, %415 : vector<8x128xf32>
      %418 = arith.divf %416, %417 : vector<8x128xf32>
      %419 = vector.extract_strided_slice %418 {offsets = [0, 0], sizes = [8, 64], strides = [1, 1]} : vector<8x128xf32> to vector<8x64xf32>
      %420 = vector.extract_strided_slice %418 {offsets = [0, 64], sizes = [8, 64], strides = [1, 1]} : vector<8x128xf32> to vector<8x64xf32>
      %421 = vector.extract_strided_slice %412 {offsets = [0, 128], sizes = [8, 64], strides = [1, 1]} : vector<8x256xf32> to vector<8x64xf32>
      %422 = math.tanh %421 : vector<8x64xf32>
      %423 = vector.extract_strided_slice %412 {offsets = [0, 192], sizes = [8, 64], strides = [1, 1]} : vector<8x256xf32> to vector<8x64xf32>
      %424 = arith.negf %423 : vector<8x64xf32>
      %425 = math.exp %424 : vector<8x64xf32>
      %cst_147 = arith.constant 1.000000e+00 : f32
      %426 = vector.broadcast %cst_147 : f32 to vector<8x64xf32>
      %427 = arith.addf %426, %425 : vector<8x64xf32>
      %428 = arith.divf %426, %427 : vector<8x64xf32>
      %429 = arith.mulf %420, %402 : vector<8x64xf32>
      %430 = arith.mulf %419, %422 : vector<8x64xf32>
      %431 = arith.addf %429, %430 : vector<8x64xf32>
      %432 = math.tanh %431 : vector<8x64xf32>
      %433 = arith.mulf %428, %432 : vector<8x64xf32>
      %434 = arith.index_cast %407 : i32 to index
      %c0_148 = arith.constant 0 : index
      %435 = vector.load %arg9[%434, %c0_148] : memref<64x64xf32, #tpu.memory_space<vmem>>, vector<8x64xf32>
      tpu.vector_store %arg9[%434, %c0_148], %433 {strides = array<i32>} : memref<64x64xf32, #tpu.memory_space<vmem>>, vector<8x64xf32>,
      %c4_i32_149 = arith.constant 4 : i32
      %c8_i32_150 = arith.constant 8 : i32
      %436 = arith.muli %c4_i32_149, %c8_i32_150 : i32
      %437 = arith.truncf %433 : vector<8x64xf32> to vector<8x64xbf16>
      %cst_151 = arith.constant dense<0.000000e+00> : vector<8x256xf32>
      %438 = tpu.matmul %437, %309, %cst_151 {dimension_numbers = #tpu.dot_dimension_numbers<[1], [0], [0], [1], [0, 0, 1, 1], [], []>} : vector<8x64xbf16>, vector<64x256xbf16>, vector<8x256xf32> -> vector<8x256xf32>
      %439 = arith.index_cast %436 : i32 to index
      %c0_152 = arith.constant 0 : index
      %440 = vector.load %arg10[%439, %c0_152] : memref<64x256xf32, #tpu.memory_space<vmem>>, vector<8x256xf32>
      %441 = arith.addf %438, %440 : vector<8x256xf32>
      %442 = vector.extract_strided_slice %441 {offsets = [0, 0], sizes = [8, 128], strides = [1, 1]} : vector<8x256xf32> to vector<8x128xf32>
      %443 = arith.negf %442 : vector<8x128xf32>
      %444 = math.exp %443 : vector<8x128xf32>
      %cst_153 = arith.constant 1.000000e+00 : f32
      %445 = vector.broadcast %cst_153 : f32 to vector<8x128xf32>
      %446 = arith.addf %445, %444 : vector<8x128xf32>
      %447 = arith.divf %445, %446 : vector<8x128xf32>
      %448 = vector.extract_strided_slice %447 {offsets = [0, 0], sizes = [8, 64], strides = [1, 1]} : vector<8x128xf32> to vector<8x64xf32>
      %449 = vector.extract_strided_slice %447 {offsets = [0, 64], sizes = [8, 64], strides = [1, 1]} : vector<8x128xf32> to vector<8x64xf32>
      %450 = vector.extract_strided_slice %441 {offsets = [0, 128], sizes = [8, 64], strides = [1, 1]} : vector<8x256xf32> to vector<8x64xf32>
      %451 = math.tanh %450 : vector<8x64xf32>
      %452 = vector.extract_strided_slice %441 {offsets = [0, 192], sizes = [8, 64], strides = [1, 1]} : vector<8x256xf32> to vector<8x64xf32>
      %453 = arith.negf %452 : vector<8x64xf32>
      %454 = math.exp %453 : vector<8x64xf32>
      %cst_154 = arith.constant 1.000000e+00 : f32
      %455 = vector.broadcast %cst_154 : f32 to vector<8x64xf32>
      %456 = arith.addf %455, %454 : vector<8x64xf32>
      %457 = arith.divf %455, %456 : vector<8x64xf32>
      %458 = arith.mulf %449, %431 : vector<8x64xf32>
      %459 = arith.mulf %448, %451 : vector<8x64xf32>
      %460 = arith.addf %458, %459 : vector<8x64xf32>
      %461 = math.tanh %460 : vector<8x64xf32>
      %462 = arith.mulf %457, %461 : vector<8x64xf32>
      %463 = arith.index_cast %436 : i32 to index
      %c0_155 = arith.constant 0 : index
      %464 = vector.load %arg9[%463, %c0_155] : memref<64x64xf32, #tpu.memory_space<vmem>>, vector<8x64xf32>
      tpu.vector_store %arg9[%463, %c0_155], %462 {strides = array<i32>} : memref<64x64xf32, #tpu.memory_space<vmem>>, vector<8x64xf32>,
      %c5_i32_156 = arith.constant 5 : i32
      %c8_i32_157 = arith.constant 8 : i32
      %465 = arith.muli %c5_i32_156, %c8_i32_157 : i32
      %466 = arith.truncf %462 : vector<8x64xf32> to vector<8x64xbf16>
      %cst_158 = arith.constant dense<0.000000e+00> : vector<8x256xf32>
      %467 = tpu.matmul %466, %309, %cst_158 {dimension_numbers = #tpu.dot_dimension_numbers<[1], [0], [0], [1], [0, 0, 1, 1], [], []>} : vector<8x64xbf16>, vector<64x256xbf16>, vector<8x256xf32> -> vector<8x256xf32>
      %468 = arith.index_cast %465 : i32 to index
      %c0_159 = arith.constant 0 : index
      %469 = vector.load %arg10[%468, %c0_159] : memref<64x256xf32, #tpu.memory_space<vmem>>, vector<8x256xf32>
      %470 = arith.addf %467, %469 : vector<8x256xf32>
      %471 = vector.extract_strided_slice %470 {offsets = [0, 0], sizes = [8, 128], strides = [1, 1]} : vector<8x256xf32> to vector<8x128xf32>
      %472 = arith.negf %471 : vector<8x128xf32>
      %473 = math.exp %472 : vector<8x128xf32>
      %cst_160 = arith.constant 1.000000e+00 : f32
      %474 = vector.broadcast %cst_160 : f32 to vector<8x128xf32>
      %475 = arith.addf %474, %473 : vector<8x128xf32>
      %476 = arith.divf %474, %475 : vector<8x128xf32>
      %477 = vector.extract_strided_slice %476 {offsets = [0, 0], sizes = [8, 64], strides = [1, 1]} : vector<8x128xf32> to vector<8x64xf32>
      %478 = vector.extract_strided_slice %476 {offsets = [0, 64], sizes = [8, 64], strides = [1, 1]} : vector<8x128xf32> to vector<8x64xf32>
      %479 = vector.extract_strided_slice %470 {offsets = [0, 128], sizes = [8, 64], strides = [1, 1]} : vector<8x256xf32> to vector<8x64xf32>
      %480 = math.tanh %479 : vector<8x64xf32>
      %481 = vector.extract_strided_slice %470 {offsets = [0, 192], sizes = [8, 64], strides = [1, 1]} : vector<8x256xf32> to vector<8x64xf32>
      %482 = arith.negf %481 : vector<8x64xf32>
      %483 = math.exp %482 : vector<8x64xf32>
      %cst_161 = arith.constant 1.000000e+00 : f32
      %484 = vector.broadcast %cst_161 : f32 to vector<8x64xf32>
      %485 = arith.addf %484, %483 : vector<8x64xf32>
      %486 = arith.divf %484, %485 : vector<8x64xf32>
      %487 = arith.mulf %478, %460 : vector<8x64xf32>
      %488 = arith.mulf %477, %480 : vector<8x64xf32>
      %489 = arith.addf %487, %488 : vector<8x64xf32>
      %490 = math.tanh %489 : vector<8x64xf32>
      %491 = arith.mulf %486, %490 : vector<8x64xf32>
      %492 = arith.index_cast %465 : i32 to index
      %c0_162 = arith.constant 0 : index
      %493 = vector.load %arg9[%492, %c0_162] : memref<64x64xf32, #tpu.memory_space<vmem>>, vector<8x64xf32>
      tpu.vector_store %arg9[%492, %c0_162], %491 {strides = array<i32>} : memref<64x64xf32, #tpu.memory_space<vmem>>, vector<8x64xf32>,
      %c6_i32_163 = arith.constant 6 : i32
      %c8_i32_164 = arith.constant 8 : i32
      %494 = arith.muli %c6_i32_163, %c8_i32_164 : i32
      %495 = arith.truncf %491 : vector<8x64xf32> to vector<8x64xbf16>
      %cst_165 = arith.constant dense<0.000000e+00> : vector<8x256xf32>
      %496 = tpu.matmul %495, %309, %cst_165 {dimension_numbers = #tpu.dot_dimension_numbers<[1], [0], [0], [1], [0, 0, 1, 1], [], []>} : vector<8x64xbf16>, vector<64x256xbf16>, vector<8x256xf32> -> vector<8x256xf32>
      %497 = arith.index_cast %494 : i32 to index
      %c0_166 = arith.constant 0 : index
      %498 = vector.load %arg10[%497, %c0_166] : memref<64x256xf32, #tpu.memory_space<vmem>>, vector<8x256xf32>
      %499 = arith.addf %496, %498 : vector<8x256xf32>
      %500 = vector.extract_strided_slice %499 {offsets = [0, 0], sizes = [8, 128], strides = [1, 1]} : vector<8x256xf32> to vector<8x128xf32>
      %501 = arith.negf %500 : vector<8x128xf32>
      %502 = math.exp %501 : vector<8x128xf32>
      %cst_167 = arith.constant 1.000000e+00 : f32
      %503 = vector.broadcast %cst_167 : f32 to vector<8x128xf32>
      %504 = arith.addf %503, %502 : vector<8x128xf32>
      %505 = arith.divf %503, %504 : vector<8x128xf32>
      %506 = vector.extract_strided_slice %505 {offsets = [0, 0], sizes = [8, 64], strides = [1, 1]} : vector<8x128xf32> to vector<8x64xf32>
      %507 = vector.extract_strided_slice %505 {offsets = [0, 64], sizes = [8, 64], strides = [1, 1]} : vector<8x128xf32> to vector<8x64xf32>
      %508 = vector.extract_strided_slice %499 {offsets = [0, 128], sizes = [8, 64], strides = [1, 1]} : vector<8x256xf32> to vector<8x64xf32>
      %509 = math.tanh %508 : vector<8x64xf32>
      %510 = vector.extract_strided_slice %499 {offsets = [0, 192], sizes = [8, 64], strides = [1, 1]} : vector<8x256xf32> to vector<8x64xf32>
      %511 = arith.negf %510 : vector<8x64xf32>
      %512 = math.exp %511 : vector<8x64xf32>
      %cst_168 = arith.constant 1.000000e+00 : f32
      %513 = vector.broadcast %cst_168 : f32 to vector<8x64xf32>
      %514 = arith.addf %513, %512 : vector<8x64xf32>
      %515 = arith.divf %513, %514 : vector<8x64xf32>
      %516 = arith.mulf %507, %489 : vector<8x64xf32>
      %517 = arith.mulf %506, %509 : vector<8x64xf32>
      %518 = arith.addf %516, %517 : vector<8x64xf32>
      %519 = math.tanh %518 : vector<8x64xf32>
      %520 = arith.mulf %515, %519 : vector<8x64xf32>
      %521 = arith.index_cast %494 : i32 to index
      %c0_169 = arith.constant 0 : index
      %522 = vector.load %arg9[%521, %c0_169] : memref<64x64xf32, #tpu.memory_space<vmem>>, vector<8x64xf32>
      tpu.vector_store %arg9[%521, %c0_169], %520 {strides = array<i32>} : memref<64x64xf32, #tpu.memory_space<vmem>>, vector<8x64xf32>,
      %c7_i32_170 = arith.constant 7 : i32
      %c8_i32_171 = arith.constant 8 : i32
      %523 = arith.muli %c7_i32_170, %c8_i32_171 : i32
      %524 = arith.truncf %520 : vector<8x64xf32> to vector<8x64xbf16>
      %cst_172 = arith.constant dense<0.000000e+00> : vector<8x256xf32>
      %525 = tpu.matmul %524, %309, %cst_172 {dimension_numbers = #tpu.dot_dimension_numbers<[1], [0], [0], [1], [0, 0, 1, 1], [], []>} : vector<8x64xbf16>, vector<64x256xbf16>, vector<8x256xf32> -> vector<8x256xf32>
      %526 = arith.index_cast %523 : i32 to index
      %c0_173 = arith.constant 0 : index
      %527 = vector.load %arg10[%526, %c0_173] : memref<64x256xf32, #tpu.memory_space<vmem>>, vector<8x256xf32>
      %528 = arith.addf %525, %527 : vector<8x256xf32>
      %529 = vector.extract_strided_slice %528 {offsets = [0, 0], sizes = [8, 128], strides = [1, 1]} : vector<8x256xf32> to vector<8x128xf32>
      %530 = arith.negf %529 : vector<8x128xf32>
      %531 = math.exp %530 : vector<8x128xf32>
      %cst_174 = arith.constant 1.000000e+00 : f32
      %532 = vector.broadcast %cst_174 : f32 to vector<8x128xf32>
      %533 = arith.addf %532, %531 : vector<8x128xf32>
      %534 = arith.divf %532, %533 : vector<8x128xf32>
      %535 = vector.extract_strided_slice %534 {offsets = [0, 0], sizes = [8, 64], strides = [1, 1]} : vector<8x128xf32> to vector<8x64xf32>
      %536 = vector.extract_strided_slice %534 {offsets = [0, 64], sizes = [8, 64], strides = [1, 1]} : vector<8x128xf32> to vector<8x64xf32>
      %537 = vector.extract_strided_slice %528 {offsets = [0, 128], sizes = [8, 64], strides = [1, 1]} : vector<8x256xf32> to vector<8x64xf32>
      %538 = math.tanh %537 : vector<8x64xf32>
      %539 = vector.extract_strided_slice %528 {offsets = [0, 192], sizes = [8, 64], strides = [1, 1]} : vector<8x256xf32> to vector<8x64xf32>
      %540 = arith.negf %539 : vector<8x64xf32>
      %541 = math.exp %540 : vector<8x64xf32>
      %cst_175 = arith.constant 1.000000e+00 : f32
      %542 = vector.broadcast %cst_175 : f32 to vector<8x64xf32>
      %543 = arith.addf %542, %541 : vector<8x64xf32>
      %544 = arith.divf %542, %543 : vector<8x64xf32>
      %545 = arith.mulf %536, %518 : vector<8x64xf32>
      %546 = arith.mulf %535, %538 : vector<8x64xf32>
      %547 = arith.addf %545, %546 : vector<8x64xf32>
      %548 = math.tanh %547 : vector<8x64xf32>
      %549 = arith.mulf %544, %548 : vector<8x64xf32>
      %550 = arith.index_cast %523 : i32 to index
      %c0_176 = arith.constant 0 : index
      %551 = vector.load %arg9[%550, %c0_176] : memref<64x64xf32, #tpu.memory_space<vmem>>, vector<8x64xf32>
      tpu.vector_store %arg9[%550, %c0_176], %549 {strides = array<i32>} : memref<64x64xf32, #tpu.memory_space<vmem>>, vector<8x64xf32>,
      %c8_i32_177 = arith.constant 8 : i32
    }
    %c31_i32_3 = arith.constant 31 : i32
    %c31 = arith.constant 31 : index
    %c0_4 = arith.constant 0 : index
    %c0_5 = arith.constant 0 : index
    %4 = vector.load %arg3[%c31, %c0_4, %c0_5] : memref<32x64x256xbf16, #tpu.memory_space<vmem>>, vector<1x64x256xbf16>
    %5 = vector.shape_cast %4 : vector<1x64x256xbf16> to vector<64x256xbf16>
    %c31_6 = arith.constant 31 : index
    %c0_7 = arith.constant 0 : index
    %c0_8 = arith.constant 0 : index
    %6 = vector.load %arg4[%c31_6, %c0_7, %c0_8] : memref<32x64x256xbf16, #tpu.memory_space<vmem>>, vector<1x64x256xbf16>
    %7 = vector.shape_cast %6 : vector<1x64x256xbf16> to vector<64x256xbf16>
    %c31_9 = arith.constant 31 : index
    %c0_10 = arith.constant 0 : index
    %c0_11 = arith.constant 0 : index
    %8 = vector.load %arg5[%c31_9, %c0_10, %c0_11] : memref<32x1x256xf32, #tpu.memory_space<vmem>>, vector<1x1x256xf32>
    %9 = vector.shape_cast %8 : vector<1x1x256xf32> to vector<1x256xf32>
    %c0_12 = arith.constant 0 : index
    %c0_13 = arith.constant 0 : index
    %10 = vector.load %arg9[%c0_12, %c0_13] : memref<64x64xf32, #tpu.memory_space<vmem>>, vector<64x64xf32>
    %11 = arith.truncf %10 : vector<64x64xf32> to vector<64x64xbf16>
    %cst_14 = arith.constant dense<0.000000e+00> : vector<64x256xf32>
    %12 = tpu.matmul %11, %5, %cst_14 {dimension_numbers = #tpu.dot_dimension_numbers<[1], [0], [0], [1], [0, 0, 1, 1], [], []>} : vector<64x64xbf16>, vector<64x256xbf16>, vector<64x256xf32> -> vector<64x256xf32>
    %13 = vector.broadcast %9 : vector<1x256xf32> to vector<64x256xf32>
    %14 = arith.addf %12, %13 : vector<64x256xf32>
    %c0_15 = arith.constant 0 : index
    %c0_16 = arith.constant 0 : index
    %15 = vector.load %arg10[%c0_15, %c0_16] : memref<64x256xf32, #tpu.memory_space<vmem>>, vector<64x256xf32>
    tpu.vector_store %arg10[%c0_15, %c0_16], %14 {strides = array<i32>} : memref<64x256xf32, #tpu.memory_space<vmem>>, vector<64x256xf32>,
    %cst_17 = arith.constant 0.000000e+00 : f32
    %16 = vector.broadcast %cst_17 : f32 to vector<8x64xf32>
    %c0_i32_18 = arith.constant 0 : i32
    %c8_i32 = arith.constant 8 : i32
    %17 = arith.muli %c0_i32_18, %c8_i32 : i32
    %18 = arith.truncf %16 : vector<8x64xf32> to vector<8x64xbf16>
    %cst_19 = arith.constant dense<0.000000e+00> : vector<8x256xf32>
    %19 = tpu.matmul %18, %7, %cst_19 {dimension_numbers = #tpu.dot_dimension_numbers<[1], [0], [0], [1], [0, 0, 1, 1], [], []>} : vector<8x64xbf16>, vector<64x256xbf16>, vector<8x256xf32> -> vector<8x256xf32>
    %20 = arith.index_cast %17 : i32 to index
    %c0_20 = arith.constant 0 : index
    %21 = vector.load %arg10[%20, %c0_20] : memref<64x256xf32, #tpu.memory_space<vmem>>, vector<8x256xf32>
    %22 = arith.addf %19, %21 : vector<8x256xf32>
    %23 = vector.extract_strided_slice %22 {offsets = [0, 0], sizes = [8, 128], strides = [1, 1]} : vector<8x256xf32> to vector<8x128xf32>
    %24 = arith.negf %23 : vector<8x128xf32>
    %25 = math.exp %24 : vector<8x128xf32>
    %cst_21 = arith.constant 1.000000e+00 : f32
    %26 = vector.broadcast %cst_21 : f32 to vector<8x128xf32>
    %27 = arith.addf %26, %25 : vector<8x128xf32>
    %28 = arith.divf %26, %27 : vector<8x128xf32>
    %29 = vector.extract_strided_slice %28 {offsets = [0, 0], sizes = [8, 64], strides = [1, 1]} : vector<8x128xf32> to vector<8x64xf32>
    %30 = vector.extract_strided_slice %28 {offsets = [0, 64], sizes = [8, 64], strides = [1, 1]} : vector<8x128xf32> to vector<8x64xf32>
    %31 = vector.extract_strided_slice %22 {offsets = [0, 128], sizes = [8, 64], strides = [1, 1]} : vector<8x256xf32> to vector<8x64xf32>
    %32 = math.tanh %31 : vector<8x64xf32>
    %33 = vector.extract_strided_slice %22 {offsets = [0, 192], sizes = [8, 64], strides = [1, 1]} : vector<8x256xf32> to vector<8x64xf32>
    %34 = arith.negf %33 : vector<8x64xf32>
    %35 = math.exp %34 : vector<8x64xf32>
    %cst_22 = arith.constant 1.000000e+00 : f32
    %36 = vector.broadcast %cst_22 : f32 to vector<8x64xf32>
    %37 = arith.addf %36, %35 : vector<8x64xf32>
    %38 = arith.divf %36, %37 : vector<8x64xf32>
    %39 = arith.mulf %30, %16 : vector<8x64xf32>
    %40 = arith.mulf %29, %32 : vector<8x64xf32>
    %41 = arith.addf %39, %40 : vector<8x64xf32>
    %42 = math.tanh %41 : vector<8x64xf32>
    %43 = arith.mulf %38, %42 : vector<8x64xf32>
    %c1_i32_23 = arith.constant 1 : i32
    %44 = arith.addi %c0_i32_18, %c1_i32_23 : i32
    %45 = vector.broadcast %44 : i32 to vector<8x1xi32>
    %46 = arith.cmpi eq, %0, %45 : vector<8x1xi32>
    %c0_24 = arith.constant 0 : index
    %c0_25 = arith.constant 0 : index
    %47 = vector.load %arg11[%c0_24, %c0_25] : memref<8x64xf32, #tpu.memory_space<vmem>>, vector<8x64xf32>
    %48 = vector.shape_cast %46 : vector<8x1xi1> to vector<8x1xi1>
    %49 = vector.broadcast %48 : vector<8x1xi1> to vector<8x64xi1>
    %50 = arith.select %49, %43, %47 : vector<8x64xi1>, vector<8x64xf32>
    %c0_26 = arith.constant 0 : index
    %c0_27 = arith.constant 0 : index
    %51 = vector.load %arg11[%c0_26, %c0_27] : memref<8x64xf32, #tpu.memory_space<vmem>>, vector<8x64xf32>
    tpu.vector_store %arg11[%c0_26, %c0_27], %50 {strides = array<i32>} : memref<8x64xf32, #tpu.memory_space<vmem>>, vector<8x64xf32>,
    %c1_i32_28 = arith.constant 1 : i32
    %c8_i32_29 = arith.constant 8 : i32
    %52 = arith.muli %c1_i32_28, %c8_i32_29 : i32
    %53 = arith.truncf %43 : vector<8x64xf32> to vector<8x64xbf16>
    %cst_30 = arith.constant dense<0.000000e+00> : vector<8x256xf32>
    %54 = tpu.matmul %53, %7, %cst_30 {dimension_numbers = #tpu.dot_dimension_numbers<[1], [0], [0], [1], [0, 0, 1, 1], [], []>} : vector<8x64xbf16>, vector<64x256xbf16>, vector<8x256xf32> -> vector<8x256xf32>
    %55 = arith.index_cast %52 : i32 to index
    %c0_31 = arith.constant 0 : index
    %56 = vector.load %arg10[%55, %c0_31] : memref<64x256xf32, #tpu.memory_space<vmem>>, vector<8x256xf32>
    %57 = arith.addf %54, %56 : vector<8x256xf32>
    %58 = vector.extract_strided_slice %57 {offsets = [0, 0], sizes = [8, 128], strides = [1, 1]} : vector<8x256xf32> to vector<8x128xf32>
    %59 = arith.negf %58 : vector<8x128xf32>
    %60 = math.exp %59 : vector<8x128xf32>
    %cst_32 = arith.constant 1.000000e+00 : f32
    %61 = vector.broadcast %cst_32 : f32 to vector<8x128xf32>
    %62 = arith.addf %61, %60 : vector<8x128xf32>
    %63 = arith.divf %61, %62 : vector<8x128xf32>
    %64 = vector.extract_strided_slice %63 {offsets = [0, 0], sizes = [8, 64], strides = [1, 1]} : vector<8x128xf32> to vector<8x64xf32>
    %65 = vector.extract_strided_slice %63 {offsets = [0, 64], sizes = [8, 64], strides = [1, 1]} : vector<8x128xf32> to vector<8x64xf32>
    %66 = vector.extract_strided_slice %57 {offsets = [0, 128], sizes = [8, 64], strides = [1, 1]} : vector<8x256xf32> to vector<8x64xf32>
    %67 = math.tanh %66 : vector<8x64xf32>
    %68 = vector.extract_strided_slice %57 {offsets = [0, 192], sizes = [8, 64], strides = [1, 1]} : vector<8x256xf32> to vector<8x64xf32>
    %69 = arith.negf %68 : vector<8x64xf32>
    %70 = math.exp %69 : vector<8x64xf32>
    %cst_33 = arith.constant 1.000000e+00 : f32
    %71 = vector.broadcast %cst_33 : f32 to vector<8x64xf32>
    %72 = arith.addf %71, %70 : vector<8x64xf32>
    %73 = arith.divf %71, %72 : vector<8x64xf32>
    %74 = arith.mulf %65, %41 : vector<8x64xf32>
    %75 = arith.mulf %64, %67 : vector<8x64xf32>
    %76 = arith.addf %74, %75 : vector<8x64xf32>
    %77 = math.tanh %76 : vector<8x64xf32>
    %78 = arith.mulf %73, %77 : vector<8x64xf32>
    %c1_i32_34 = arith.constant 1 : i32
    %79 = arith.addi %c1_i32_28, %c1_i32_34 : i32
    %80 = vector.broadcast %79 : i32 to vector<8x1xi32>
    %81 = arith.cmpi eq, %0, %80 : vector<8x1xi32>
    %c0_35 = arith.constant 0 : index
    %c0_36 = arith.constant 0 : index
    %82 = vector.load %arg11[%c0_35, %c0_36] : memref<8x64xf32, #tpu.memory_space<vmem>>, vector<8x64xf32>
    %83 = vector.shape_cast %81 : vector<8x1xi1> to vector<8x1xi1>
    %84 = vector.broadcast %83 : vector<8x1xi1> to vector<8x64xi1>
    %85 = arith.select %84, %78, %82 : vector<8x64xi1>, vector<8x64xf32>
    %c0_37 = arith.constant 0 : index
    %c0_38 = arith.constant 0 : index
    %86 = vector.load %arg11[%c0_37, %c0_38] : memref<8x64xf32, #tpu.memory_space<vmem>>, vector<8x64xf32>
    tpu.vector_store %arg11[%c0_37, %c0_38], %85 {strides = array<i32>} : memref<8x64xf32, #tpu.memory_space<vmem>>, vector<8x64xf32>,
    %c2_i32 = arith.constant 2 : i32
    %c8_i32_39 = arith.constant 8 : i32
    %87 = arith.muli %c2_i32, %c8_i32_39 : i32
    %88 = arith.truncf %78 : vector<8x64xf32> to vector<8x64xbf16>
    %cst_40 = arith.constant dense<0.000000e+00> : vector<8x256xf32>
    %89 = tpu.matmul %88, %7, %cst_40 {dimension_numbers = #tpu.dot_dimension_numbers<[1], [0], [0], [1], [0, 0, 1, 1], [], []>} : vector<8x64xbf16>, vector<64x256xbf16>, vector<8x256xf32> -> vector<8x256xf32>
    %90 = arith.index_cast %87 : i32 to index
    %c0_41 = arith.constant 0 : index
    %91 = vector.load %arg10[%90, %c0_41] : memref<64x256xf32, #tpu.memory_space<vmem>>, vector<8x256xf32>
    %92 = arith.addf %89, %91 : vector<8x256xf32>
    %93 = vector.extract_strided_slice %92 {offsets = [0, 0], sizes = [8, 128], strides = [1, 1]} : vector<8x256xf32> to vector<8x128xf32>
    %94 = arith.negf %93 : vector<8x128xf32>
    %95 = math.exp %94 : vector<8x128xf32>
    %cst_42 = arith.constant 1.000000e+00 : f32
    %96 = vector.broadcast %cst_42 : f32 to vector<8x128xf32>
    %97 = arith.addf %96, %95 : vector<8x128xf32>
    %98 = arith.divf %96, %97 : vector<8x128xf32>
    %99 = vector.extract_strided_slice %98 {offsets = [0, 0], sizes = [8, 64], strides = [1, 1]} : vector<8x128xf32> to vector<8x64xf32>
    %100 = vector.extract_strided_slice %98 {offsets = [0, 64], sizes = [8, 64], strides = [1, 1]} : vector<8x128xf32> to vector<8x64xf32>
    %101 = vector.extract_strided_slice %92 {offsets = [0, 128], sizes = [8, 64], strides = [1, 1]} : vector<8x256xf32> to vector<8x64xf32>
    %102 = math.tanh %101 : vector<8x64xf32>
    %103 = vector.extract_strided_slice %92 {offsets = [0, 192], sizes = [8, 64], strides = [1, 1]} : vector<8x256xf32> to vector<8x64xf32>
    %104 = arith.negf %103 : vector<8x64xf32>
    %105 = math.exp %104 : vector<8x64xf32>
    %cst_43 = arith.constant 1.000000e+00 : f32
    %106 = vector.broadcast %cst_43 : f32 to vector<8x64xf32>
    %107 = arith.addf %106, %105 : vector<8x64xf32>
    %108 = arith.divf %106, %107 : vector<8x64xf32>
    %109 = arith.mulf %100, %76 : vector<8x64xf32>
    %110 = arith.mulf %99, %102 : vector<8x64xf32>
    %111 = arith.addf %109, %110 : vector<8x64xf32>
    %112 = math.tanh %111 : vector<8x64xf32>
    %113 = arith.mulf %108, %112 : vector<8x64xf32>
    %c1_i32_44 = arith.constant 1 : i32
    %114 = arith.addi %c2_i32, %c1_i32_44 : i32
    %115 = vector.broadcast %114 : i32 to vector<8x1xi32>
    %116 = arith.cmpi eq, %0, %115 : vector<8x1xi32>
    %c0_45 = arith.constant 0 : index
    %c0_46 = arith.constant 0 : index
    %117 = vector.load %arg11[%c0_45, %c0_46] : memref<8x64xf32, #tpu.memory_space<vmem>>, vector<8x64xf32>
    %118 = vector.shape_cast %116 : vector<8x1xi1> to vector<8x1xi1>
    %119 = vector.broadcast %118 : vector<8x1xi1> to vector<8x64xi1>
    %120 = arith.select %119, %113, %117 : vector<8x64xi1>, vector<8x64xf32>
    %c0_47 = arith.constant 0 : index
    %c0_48 = arith.constant 0 : index
    %121 = vector.load %arg11[%c0_47, %c0_48] : memref<8x64xf32, #tpu.memory_space<vmem>>, vector<8x64xf32>
    tpu.vector_store %arg11[%c0_47, %c0_48], %120 {strides = array<i32>} : memref<8x64xf32, #tpu.memory_space<vmem>>, vector<8x64xf32>,
    %c3_i32 = arith.constant 3 : i32
    %c8_i32_49 = arith.constant 8 : i32
    %122 = arith.muli %c3_i32, %c8_i32_49 : i32
    %123 = arith.truncf %113 : vector<8x64xf32> to vector<8x64xbf16>
    %cst_50 = arith.constant dense<0.000000e+00> : vector<8x256xf32>
    %124 = tpu.matmul %123, %7, %cst_50 {dimension_numbers = #tpu.dot_dimension_numbers<[1], [0], [0], [1], [0, 0, 1, 1], [], []>} : vector<8x64xbf16>, vector<64x256xbf16>, vector<8x256xf32> -> vector<8x256xf32>
    %125 = arith.index_cast %122 : i32 to index
    %c0_51 = arith.constant 0 : index
    %126 = vector.load %arg10[%125, %c0_51] : memref<64x256xf32, #tpu.memory_space<vmem>>, vector<8x256xf32>
    %127 = arith.addf %124, %126 : vector<8x256xf32>
    %128 = vector.extract_strided_slice %127 {offsets = [0, 0], sizes = [8, 128], strides = [1, 1]} : vector<8x256xf32> to vector<8x128xf32>
    %129 = arith.negf %128 : vector<8x128xf32>
    %130 = math.exp %129 : vector<8x128xf32>
    %cst_52 = arith.constant 1.000000e+00 : f32
    %131 = vector.broadcast %cst_52 : f32 to vector<8x128xf32>
    %132 = arith.addf %131, %130 : vector<8x128xf32>
    %133 = arith.divf %131, %132 : vector<8x128xf32>
    %134 = vector.extract_strided_slice %133 {offsets = [0, 0], sizes = [8, 64], strides = [1, 1]} : vector<8x128xf32> to vector<8x64xf32>
    %135 = vector.extract_strided_slice %133 {offsets = [0, 64], sizes = [8, 64], strides = [1, 1]} : vector<8x128xf32> to vector<8x64xf32>
    %136 = vector.extract_strided_slice %127 {offsets = [0, 128], sizes = [8, 64], strides = [1, 1]} : vector<8x256xf32> to vector<8x64xf32>
    %137 = math.tanh %136 : vector<8x64xf32>
    %138 = vector.extract_strided_slice %127 {offsets = [0, 192], sizes = [8, 64], strides = [1, 1]} : vector<8x256xf32> to vector<8x64xf32>
    %139 = arith.negf %138 : vector<8x64xf32>
    %140 = math.exp %139 : vector<8x64xf32>
    %cst_53 = arith.constant 1.000000e+00 : f32
    %141 = vector.broadcast %cst_53 : f32 to vector<8x64xf32>
    %142 = arith.addf %141, %140 : vector<8x64xf32>
    %143 = arith.divf %141, %142 : vector<8x64xf32>
    %144 = arith.mulf %135, %111 : vector<8x64xf32>
    %145 = arith.mulf %134, %137 : vector<8x64xf32>
    %146 = arith.addf %144, %145 : vector<8x64xf32>
    %147 = math.tanh %146 : vector<8x64xf32>
    %148 = arith.mulf %143, %147 : vector<8x64xf32>
    %c1_i32_54 = arith.constant 1 : i32
    %149 = arith.addi %c3_i32, %c1_i32_54 : i32
    %150 = vector.broadcast %149 : i32 to vector<8x1xi32>
    %151 = arith.cmpi eq, %0, %150 : vector<8x1xi32>
    %c0_55 = arith.constant 0 : index
    %c0_56 = arith.constant 0 : index
    %152 = vector.load %arg11[%c0_55, %c0_56] : memref<8x64xf32, #tpu.memory_space<vmem>>, vector<8x64xf32>
    %153 = vector.shape_cast %151 : vector<8x1xi1> to vector<8x1xi1>
    %154 = vector.broadcast %153 : vector<8x1xi1> to vector<8x64xi1>
    %155 = arith.select %154, %148, %152 : vector<8x64xi1>, vector<8x64xf32>
    %c0_57 = arith.constant 0 : index
    %c0_58 = arith.constant 0 : index
    %156 = vector.load %arg11[%c0_57, %c0_58] : memref<8x64xf32, #tpu.memory_space<vmem>>, vector<8x64xf32>
    tpu.vector_store %arg11[%c0_57, %c0_58], %155 {strides = array<i32>} : memref<8x64xf32, #tpu.memory_space<vmem>>, vector<8x64xf32>,
    %c4_i32 = arith.constant 4 : i32
    %c8_i32_59 = arith.constant 8 : i32
    %157 = arith.muli %c4_i32, %c8_i32_59 : i32
    %158 = arith.truncf %148 : vector<8x64xf32> to vector<8x64xbf16>
    %cst_60 = arith.constant dense<0.000000e+00> : vector<8x256xf32>
    %159 = tpu.matmul %158, %7, %cst_60 {dimension_numbers = #tpu.dot_dimension_numbers<[1], [0], [0], [1], [0, 0, 1, 1], [], []>} : vector<8x64xbf16>, vector<64x256xbf16>, vector<8x256xf32> -> vector<8x256xf32>
    %160 = arith.index_cast %157 : i32 to index
    %c0_61 = arith.constant 0 : index
    %161 = vector.load %arg10[%160, %c0_61] : memref<64x256xf32, #tpu.memory_space<vmem>>, vector<8x256xf32>
    %162 = arith.addf %159, %161 : vector<8x256xf32>
    %163 = vector.extract_strided_slice %162 {offsets = [0, 0], sizes = [8, 128], strides = [1, 1]} : vector<8x256xf32> to vector<8x128xf32>
    %164 = arith.negf %163 : vector<8x128xf32>
    %165 = math.exp %164 : vector<8x128xf32>
    %cst_62 = arith.constant 1.000000e+00 : f32
    %166 = vector.broadcast %cst_62 : f32 to vector<8x128xf32>
    %167 = arith.addf %166, %165 : vector<8x128xf32>
    %168 = arith.divf %166, %167 : vector<8x128xf32>
    %169 = vector.extract_strided_slice %168 {offsets = [0, 0], sizes = [8, 64], strides = [1, 1]} : vector<8x128xf32> to vector<8x64xf32>
    %170 = vector.extract_strided_slice %168 {offsets = [0, 64], sizes = [8, 64], strides = [1, 1]} : vector<8x128xf32> to vector<8x64xf32>
    %171 = vector.extract_strided_slice %162 {offsets = [0, 128], sizes = [8, 64], strides = [1, 1]} : vector<8x256xf32> to vector<8x64xf32>
    %172 = math.tanh %171 : vector<8x64xf32>
    %173 = vector.extract_strided_slice %162 {offsets = [0, 192], sizes = [8, 64], strides = [1, 1]} : vector<8x256xf32> to vector<8x64xf32>
    %174 = arith.negf %173 : vector<8x64xf32>
    %175 = math.exp %174 : vector<8x64xf32>
    %cst_63 = arith.constant 1.000000e+00 : f32
    %176 = vector.broadcast %cst_63 : f32 to vector<8x64xf32>
    %177 = arith.addf %176, %175 : vector<8x64xf32>
    %178 = arith.divf %176, %177 : vector<8x64xf32>
    %179 = arith.mulf %170, %146 : vector<8x64xf32>
    %180 = arith.mulf %169, %172 : vector<8x64xf32>
    %181 = arith.addf %179, %180 : vector<8x64xf32>
    %182 = math.tanh %181 : vector<8x64xf32>
    %183 = arith.mulf %178, %182 : vector<8x64xf32>
    %c1_i32_64 = arith.constant 1 : i32
    %184 = arith.addi %c4_i32, %c1_i32_64 : i32
    %185 = vector.broadcast %184 : i32 to vector<8x1xi32>
    %186 = arith.cmpi eq, %0, %185 : vector<8x1xi32>
    %c0_65 = arith.constant 0 : index
    %c0_66 = arith.constant 0 : index
    %187 = vector.load %arg11[%c0_65, %c0_66] : memref<8x64xf32, #tpu.memory_space<vmem>>, vector<8x64xf32>
    %188 = vector.shape_cast %186 : vector<8x1xi1> to vector<8x1xi1>
    %189 = vector.broadcast %188 : vector<8x1xi1> to vector<8x64xi1>
    %190 = arith.select %189, %183, %187 : vector<8x64xi1>, vector<8x64xf32>
    %c0_67 = arith.constant 0 : index
    %c0_68 = arith.constant 0 : index
    %191 = vector.load %arg11[%c0_67, %c0_68] : memref<8x64xf32, #tpu.memory_space<vmem>>, vector<8x64xf32>
    tpu.vector_store %arg11[%c0_67, %c0_68], %190 {strides = array<i32>} : memref<8x64xf32, #tpu.memory_space<vmem>>, vector<8x64xf32>,
    %c5_i32 = arith.constant 5 : i32
    %c8_i32_69 = arith.constant 8 : i32
    %192 = arith.muli %c5_i32, %c8_i32_69 : i32
    %193 = arith.truncf %183 : vector<8x64xf32> to vector<8x64xbf16>
    %cst_70 = arith.constant dense<0.000000e+00> : vector<8x256xf32>
    %194 = tpu.matmul %193, %7, %cst_70 {dimension_numbers = #tpu.dot_dimension_numbers<[1], [0], [0], [1], [0, 0, 1, 1], [], []>} : vector<8x64xbf16>, vector<64x256xbf16>, vector<8x256xf32> -> vector<8x256xf32>
    %195 = arith.index_cast %192 : i32 to index
    %c0_71 = arith.constant 0 : index
    %196 = vector.load %arg10[%195, %c0_71] : memref<64x256xf32, #tpu.memory_space<vmem>>, vector<8x256xf32>
    %197 = arith.addf %194, %196 : vector<8x256xf32>
    %198 = vector.extract_strided_slice %197 {offsets = [0, 0], sizes = [8, 128], strides = [1, 1]} : vector<8x256xf32> to vector<8x128xf32>
    %199 = arith.negf %198 : vector<8x128xf32>
    %200 = math.exp %199 : vector<8x128xf32>
    %cst_72 = arith.constant 1.000000e+00 : f32
    %201 = vector.broadcast %cst_72 : f32 to vector<8x128xf32>
    %202 = arith.addf %201, %200 : vector<8x128xf32>
    %203 = arith.divf %201, %202 : vector<8x128xf32>
    %204 = vector.extract_strided_slice %203 {offsets = [0, 0], sizes = [8, 64], strides = [1, 1]} : vector<8x128xf32> to vector<8x64xf32>
    %205 = vector.extract_strided_slice %203 {offsets = [0, 64], sizes = [8, 64], strides = [1, 1]} : vector<8x128xf32> to vector<8x64xf32>
    %206 = vector.extract_strided_slice %197 {offsets = [0, 128], sizes = [8, 64], strides = [1, 1]} : vector<8x256xf32> to vector<8x64xf32>
    %207 = math.tanh %206 : vector<8x64xf32>
    %208 = vector.extract_strided_slice %197 {offsets = [0, 192], sizes = [8, 64], strides = [1, 1]} : vector<8x256xf32> to vector<8x64xf32>
    %209 = arith.negf %208 : vector<8x64xf32>
    %210 = math.exp %209 : vector<8x64xf32>
    %cst_73 = arith.constant 1.000000e+00 : f32
    %211 = vector.broadcast %cst_73 : f32 to vector<8x64xf32>
    %212 = arith.addf %211, %210 : vector<8x64xf32>
    %213 = arith.divf %211, %212 : vector<8x64xf32>
    %214 = arith.mulf %205, %181 : vector<8x64xf32>
    %215 = arith.mulf %204, %207 : vector<8x64xf32>
    %216 = arith.addf %214, %215 : vector<8x64xf32>
    %217 = math.tanh %216 : vector<8x64xf32>
    %218 = arith.mulf %213, %217 : vector<8x64xf32>
    %c1_i32_74 = arith.constant 1 : i32
    %219 = arith.addi %c5_i32, %c1_i32_74 : i32
    %220 = vector.broadcast %219 : i32 to vector<8x1xi32>
    %221 = arith.cmpi eq, %0, %220 : vector<8x1xi32>
    %c0_75 = arith.constant 0 : index
    %c0_76 = arith.constant 0 : index
    %222 = vector.load %arg11[%c0_75, %c0_76] : memref<8x64xf32, #tpu.memory_space<vmem>>, vector<8x64xf32>
    %223 = vector.shape_cast %221 : vector<8x1xi1> to vector<8x1xi1>
    %224 = vector.broadcast %223 : vector<8x1xi1> to vector<8x64xi1>
    %225 = arith.select %224, %218, %222 : vector<8x64xi1>, vector<8x64xf32>
    %c0_77 = arith.constant 0 : index
    %c0_78 = arith.constant 0 : index
    %226 = vector.load %arg11[%c0_77, %c0_78] : memref<8x64xf32, #tpu.memory_space<vmem>>, vector<8x64xf32>
    tpu.vector_store %arg11[%c0_77, %c0_78], %225 {strides = array<i32>} : memref<8x64xf32, #tpu.memory_space<vmem>>, vector<8x64xf32>,
    %c6_i32 = arith.constant 6 : i32
    %c8_i32_79 = arith.constant 8 : i32
    %227 = arith.muli %c6_i32, %c8_i32_79 : i32
    %228 = arith.truncf %218 : vector<8x64xf32> to vector<8x64xbf16>
    %cst_80 = arith.constant dense<0.000000e+00> : vector<8x256xf32>
    %229 = tpu.matmul %228, %7, %cst_80 {dimension_numbers = #tpu.dot_dimension_numbers<[1], [0], [0], [1], [0, 0, 1, 1], [], []>} : vector<8x64xbf16>, vector<64x256xbf16>, vector<8x256xf32> -> vector<8x256xf32>
    %230 = arith.index_cast %227 : i32 to index
    %c0_81 = arith.constant 0 : index
    %231 = vector.load %arg10[%230, %c0_81] : memref<64x256xf32, #tpu.memory_space<vmem>>, vector<8x256xf32>
    %232 = arith.addf %229, %231 : vector<8x256xf32>
    %233 = vector.extract_strided_slice %232 {offsets = [0, 0], sizes = [8, 128], strides = [1, 1]} : vector<8x256xf32> to vector<8x128xf32>
    %234 = arith.negf %233 : vector<8x128xf32>
    %235 = math.exp %234 : vector<8x128xf32>
    %cst_82 = arith.constant 1.000000e+00 : f32
    %236 = vector.broadcast %cst_82 : f32 to vector<8x128xf32>
    %237 = arith.addf %236, %235 : vector<8x128xf32>
    %238 = arith.divf %236, %237 : vector<8x128xf32>
    %239 = vector.extract_strided_slice %238 {offsets = [0, 0], sizes = [8, 64], strides = [1, 1]} : vector<8x128xf32> to vector<8x64xf32>
    %240 = vector.extract_strided_slice %238 {offsets = [0, 64], sizes = [8, 64], strides = [1, 1]} : vector<8x128xf32> to vector<8x64xf32>
    %241 = vector.extract_strided_slice %232 {offsets = [0, 128], sizes = [8, 64], strides = [1, 1]} : vector<8x256xf32> to vector<8x64xf32>
    %242 = math.tanh %241 : vector<8x64xf32>
    %243 = vector.extract_strided_slice %232 {offsets = [0, 192], sizes = [8, 64], strides = [1, 1]} : vector<8x256xf32> to vector<8x64xf32>
    %244 = arith.negf %243 : vector<8x64xf32>
    %245 = math.exp %244 : vector<8x64xf32>
    %cst_83 = arith.constant 1.000000e+00 : f32
    %246 = vector.broadcast %cst_83 : f32 to vector<8x64xf32>
    %247 = arith.addf %246, %245 : vector<8x64xf32>
    %248 = arith.divf %246, %247 : vector<8x64xf32>
    %249 = arith.mulf %240, %216 : vector<8x64xf32>
    %250 = arith.mulf %239, %242 : vector<8x64xf32>
    %251 = arith.addf %249, %250 : vector<8x64xf32>
    %252 = math.tanh %251 : vector<8x64xf32>
    %253 = arith.mulf %248, %252 : vector<8x64xf32>
    %c1_i32_84 = arith.constant 1 : i32
    %254 = arith.addi %c6_i32, %c1_i32_84 : i32
    %255 = vector.broadcast %254 : i32 to vector<8x1xi32>
    %256 = arith.cmpi eq, %0, %255 : vector<8x1xi32>
    %c0_85 = arith.constant 0 : index
    %c0_86 = arith.constant 0 : index
    %257 = vector.load %arg11[%c0_85, %c0_86] : memref<8x64xf32, #tpu.memory_space<vmem>>, vector<8x64xf32>
    %258 = vector.shape_cast %256 : vector<8x1xi1> to vector<8x1xi1>
    %259 = vector.broadcast %258 : vector<8x1xi1> to vector<8x64xi1>
    %260 = arith.select %259, %253, %257 : vector<8x64xi1>, vector<8x64xf32>
    %c0_87 = arith.constant 0 : index
    %c0_88 = arith.constant 0 : index
    %261 = vector.load %arg11[%c0_87, %c0_88] : memref<8x64xf32, #tpu.memory_space<vmem>>, vector<8x64xf32>
    tpu.vector_store %arg11[%c0_87, %c0_88], %260 {strides = array<i32>} : memref<8x64xf32, #tpu.memory_space<vmem>>, vector<8x64xf32>,
    %c7_i32 = arith.constant 7 : i32
    %c8_i32_89 = arith.constant 8 : i32
    %262 = arith.muli %c7_i32, %c8_i32_89 : i32
    %263 = arith.truncf %253 : vector<8x64xf32> to vector<8x64xbf16>
    %cst_90 = arith.constant dense<0.000000e+00> : vector<8x256xf32>
    %264 = tpu.matmul %263, %7, %cst_90 {dimension_numbers = #tpu.dot_dimension_numbers<[1], [0], [0], [1], [0, 0, 1, 1], [], []>} : vector<8x64xbf16>, vector<64x256xbf16>, vector<8x256xf32> -> vector<8x256xf32>
    %265 = arith.index_cast %262 : i32 to index
    %c0_91 = arith.constant 0 : index
    %266 = vector.load %arg10[%265, %c0_91] : memref<64x256xf32, #tpu.memory_space<vmem>>, vector<8x256xf32>
    %267 = arith.addf %264, %266 : vector<8x256xf32>
    %268 = vector.extract_strided_slice %267 {offsets = [0, 0], sizes = [8, 128], strides = [1, 1]} : vector<8x256xf32> to vector<8x128xf32>
    %269 = arith.negf %268 : vector<8x128xf32>
    %270 = math.exp %269 : vector<8x128xf32>
    %cst_92 = arith.constant 1.000000e+00 : f32
    %271 = vector.broadcast %cst_92 : f32 to vector<8x128xf32>
    %272 = arith.addf %271, %270 : vector<8x128xf32>
    %273 = arith.divf %271, %272 : vector<8x128xf32>
    %274 = vector.extract_strided_slice %273 {offsets = [0, 0], sizes = [8, 64], strides = [1, 1]} : vector<8x128xf32> to vector<8x64xf32>
    %275 = vector.extract_strided_slice %273 {offsets = [0, 64], sizes = [8, 64], strides = [1, 1]} : vector<8x128xf32> to vector<8x64xf32>
    %276 = vector.extract_strided_slice %267 {offsets = [0, 128], sizes = [8, 64], strides = [1, 1]} : vector<8x256xf32> to vector<8x64xf32>
    %277 = math.tanh %276 : vector<8x64xf32>
    %278 = vector.extract_strided_slice %267 {offsets = [0, 192], sizes = [8, 64], strides = [1, 1]} : vector<8x256xf32> to vector<8x64xf32>
    %279 = arith.negf %278 : vector<8x64xf32>
    %280 = math.exp %279 : vector<8x64xf32>
    %cst_93 = arith.constant 1.000000e+00 : f32
    %281 = vector.broadcast %cst_93 : f32 to vector<8x64xf32>
    %282 = arith.addf %281, %280 : vector<8x64xf32>
    %283 = arith.divf %281, %282 : vector<8x64xf32>
    %284 = arith.mulf %275, %251 : vector<8x64xf32>
    %285 = arith.mulf %274, %277 : vector<8x64xf32>
    %286 = arith.addf %284, %285 : vector<8x64xf32>
    %287 = math.tanh %286 : vector<8x64xf32>
    %288 = arith.mulf %283, %287 : vector<8x64xf32>
    %c1_i32_94 = arith.constant 1 : i32
    %289 = arith.addi %c7_i32, %c1_i32_94 : i32
    %290 = vector.broadcast %289 : i32 to vector<8x1xi32>
    %291 = arith.cmpi eq, %0, %290 : vector<8x1xi32>
    %c0_95 = arith.constant 0 : index
    %c0_96 = arith.constant 0 : index
    %292 = vector.load %arg11[%c0_95, %c0_96] : memref<8x64xf32, #tpu.memory_space<vmem>>, vector<8x64xf32>
    %293 = vector.shape_cast %291 : vector<8x1xi1> to vector<8x1xi1>
    %294 = vector.broadcast %293 : vector<8x1xi1> to vector<8x64xi1>
    %295 = arith.select %294, %288, %292 : vector<8x64xi1>, vector<8x64xf32>
    %c0_97 = arith.constant 0 : index
    %c0_98 = arith.constant 0 : index
    %296 = vector.load %arg11[%c0_97, %c0_98] : memref<8x64xf32, #tpu.memory_space<vmem>>, vector<8x64xf32>
    tpu.vector_store %arg11[%c0_97, %c0_98], %295 {strides = array<i32>} : memref<8x64xf32, #tpu.memory_space<vmem>>, vector<8x64xf32>,
    %c8_i32_99 = arith.constant 8 : i32
    %c0_100 = arith.constant 0 : index
    %c0_101 = arith.constant 0 : index
    %297 = vector.load %arg11[%c0_100, %c0_101] : memref<8x64xf32, #tpu.memory_space<vmem>>, vector<8x64xf32>
    %c0_102 = arith.constant 0 : index
    %c0_103 = arith.constant 0 : index
    %298 = vector.load %arg6[%c0_102, %c0_103] : memref<64x4xf32, #tpu.memory_space<vmem>>, vector<64x4xf32>
    %cst_104 = arith.constant dense<0.000000e+00> : vector<8x4xf32>
    %299 = tpu.matmul %297, %298, %cst_104 {dimension_numbers = #tpu.dot_dimension_numbers<[1], [0], [0], [1], [0, 0, 1, 1], [], []>} : vector<8x64xf32>, vector<64x4xf32>, vector<8x4xf32> -> vector<8x4xf32>
    %c0_105 = arith.constant 0 : index
    %c0_106 = arith.constant 0 : index
    %300 = vector.load %arg7[%c0_105, %c0_106] : memref<1x4xf32, #tpu.memory_space<vmem>>, vector<1x4xf32>
    %301 = vector.broadcast %300 : vector<1x4xf32> to vector<8x4xf32>
    %302 = arith.addf %299, %301 : vector<8x4xf32>
    %c0_107 = arith.constant 0 : index
    %c0_108 = arith.constant 0 : index
    %303 = vector.load %arg8[%c0_107, %c0_108] : memref<8x4xf32, #tpu.memory_space<vmem>>, vector<8x4xf32>
    tpu.vector_store %arg8[%c0_107, %c0_108], %302 {strides = array<i32>} : memref<8x4xf32, #tpu.memory_space<vmem>>, vector<8x4xf32>,
    return
  }
  func.func @transform_1(%arg0: i32) -> (i32, i32) {
    %c0_i32 = arith.constant 0 : i32
    %c0_i32_0 = arith.constant 0 : i32
    %c0_i32_1 = arith.constant 0 : i32
    return %c0_i32, %c0_i32_0 : i32, i32
  }
  func.func @transform_2(%arg0: i32) -> (i32, i32, i32) {
    %c0_i32 = arith.constant 0 : i32
    %c0_i32_0 = arith.constant 0 : i32
    %c0_i32_1 = arith.constant 0 : i32
    %c0_i32_2 = arith.constant 0 : i32
    return %c0_i32, %c0_i32_0, %c0_i32_1 : i32, i32, i32
  }
  func.func @transform_3(%arg0: i32) -> (i32, i32, i32) {
    %c0_i32 = arith.constant 0 : i32
    %c0_i32_0 = arith.constant 0 : i32
    %c0_i32_1 = arith.constant 0 : i32
    %c0_i32_2 = arith.constant 0 : i32
    return %c0_i32, %c0_i32_0, %c0_i32_1 : i32, i32, i32
  }
  func.func @transform_4(%arg0: i32) -> (i32, i32, i32) {
    %c0_i32 = arith.constant 0 : i32
    %c0_i32_0 = arith.constant 0 : i32
    %c0_i32_1 = arith.constant 0 : i32
    %c0_i32_2 = arith.constant 0 : i32
    return %c0_i32, %c0_i32_0, %c0_i32_1 : i32, i32, i32
  }
  func.func @transform_5(%arg0: i32) -> (i32, i32) {
    %c0_i32 = arith.constant 0 : i32
    %c0_i32_0 = arith.constant 0 : i32
    %c0_i32_1 = arith.constant 0 : i32
    return %c0_i32, %c0_i32_0 : i32, i32
  }
  func.func @transform_6(%arg0: i32) -> (i32, i32) {
    %c0_i32 = arith.constant 0 : i32
    %c0_i32_0 = arith.constant 0 : i32
    %c0_i32_1 = arith.constant 0 : i32
    return %c0_i32, %c0_i32_0 : i32, i32
  }
  func.func @transform_7(%arg0: i32) -> (i32, i32) {
    %c0_i32 = arith.constant 0 : i32
    %c0_i32_0 = arith.constant 0 : i32
    %c0_i32_1 = arith.constant 0 : i32
    return %c0_i32, %c0_i32_0 : i32, i32
  }
}

</mosaic_0001>

<bundles_post_ra>
// kernel: tpu_custom_call.1
= control target key start
LH: loop header
LB: loop body
LE: loop exit
PB: predicated region body
PF: predicated region fallthrough
CT: control target
= control target key end

     0   :  { %12 = vsyncpa [#allocation7], 0  ;;  %s3157_s0 = inlined_call_operand.vmem [shape: f32[64,64], index: 0, kind: input, shape index: {}]   ;;  %s3158_s1 = inlined_call_operand.vmem [shape: s32[8,1], index: 1, kind: input, shape index: {}]   ;;  %s3159_s2 = inlined_call_operand.hbm [shape: bf16[32,64,256], index: 2, kind: input, shape index: {}]   ;;  %s3160_s3 = inlined_call_operand.hbm [shape: bf16[32,64,256], index: 3, kind: input, shape index: {}]   ;;  %s3161_s4 = inlined_call_operand.hbm [shape: f32[32,1,256], index: 4, kind: input, shape index: {}]   ;;  %s3162_s5 = inlined_call_operand.vmem [shape: f32[64,4], index: 5, kind: input, shape index: {}]   ;;  %s3163_s6 = inlined_call_operand.vmem [shape: f32[1,4], index: 6, kind: input, shape index: {}]   ;;  %s3164_s7 = inlined_call_operand.vmem [shape: f32[8,4], index: 7, kind: output, shape index: {}]  }
   0x1   :  { %13 = vsyncpa [#allocation9], 0  ;;  %s2507_s24 = smov [#allocation8]   ;;  %s2508_s26 = smov [#allocation6]  }
   0x2   :  { %s33_s25 = sshll.u32 %s2507_s24, 4  ;;  %s21_s27 = sshll.u32 %s2508_s26, 4  ;;  %s34_s25 = int_to_ptr.vmem [resolvable:$true] %s33_s25  ;;  %s2561_s27 = int_to_ptr.vmem [resolvable:$true] %s21_s27 }
   0x3   :  { %s2427_s30 = scalar_lea.hbm %s3160_s3, 32768 }
   0x4   :  { %p2428_p0 = scmp.ne.s32.totalorder %s3160_s3, %s2427_s30  ;;  %p2431_p1 = scmp.lt.u32.totalorder %s2427_s30, %s3160_s3 }
   0x6   :  { %p2433_p2 = pnand %p2431_p1, %p2428_p0 }
   0x8   :  { %2436 = shalt.err (!%p2433_p2)
}
   0x9   :  { %s2437_s12 = scalar_lea.vmem %s34_s25, 32768  ;;  %p2442_p4 = scmp.lt.s32.totalorder %s34_s25, %s34_s25 }
   0xa   :  { %p2438_p3 = scmp.ne.s32.totalorder %s34_s25, %s2437_s12  ;;  %p2443_p5 = scmp.lt.s32.totalorder %s2437_s12, %s2437_s12 }
   0xc   :  { %p2444_p6 = por %p2443_p5, %p2442_p4 }
   0xe   :  { %p2445_p7 = pnand %p2444_p6, %p2438_p3 }
  0x10   :  { %2448 = shalt.err (!%p2445_p7)
}
  0x11   :  { %s2509_s13 = smov 128   ;;  %s2510_s14 = smov 8  }
  0x12   :  { %39 = dma.hbm_to_vmem [thread:$0]  %s3160_s3, 32768, %s34_s25, [#allocation9], %s2509_s13, %s2509_s13, %s2510_s14  }
  0x13   :  { %s2449_s19 = scalar_lea.hbm %s3159_s2, 32768 }
  0x14   :  { %p2450_p8 = scmp.ne.s32.totalorder %s3159_s2, %s2449_s19  ;;  %p2453_p9 = scmp.lt.u32.totalorder %s2449_s19, %s3159_s2 }
  0x16   :  { %p2455_p10 = pnand %p2453_p9, %p2450_p8 }
  0x18   :  { %2458 = shalt.err (!%p2455_p10)
}
  0x19   :  { %s2459_s24 = scalar_lea.vmem %s2561_s27, 32768  ;;  %p2464_p12 = scmp.lt.s32.totalorder %s2561_s27, %s2561_s27 }
  0x1a   :  { %p2460_p11 = scmp.ne.s32.totalorder %s2561_s27, %s2459_s24  ;;  %p2465_p13 = scmp.lt.s32.totalorder %s2459_s24, %s2459_s24 }
  0x1c   :  { %p2466_p0 = por %p2465_p13, %p2464_p12 }
  0x1e   :  { %p2467_p1 = pnand %p2466_p0, %p2460_p11 }
  0x20   :  { %2470 = shalt.err (!%p2467_p1)
}
  0x21   :  { %27 = dma.hbm_to_vmem [thread:$0]  %s3159_s2, 32768, %s2561_s27, [#allocation7], %s2509_s13, %s2509_s13, %s2510_s14  }
  0x22   :  { %s2511_s26 = smov [#allocation10]   ;;  %s2471_s8 = scalar_lea.hbm %s3161_s4, 1024 }
  0x23   :  { %s45_s28 = sshll.u32 %s2511_s26, 4  ;;  %p2472_p2 = scmp.ne.s32.totalorder %s3161_s4, %s2471_s8  ;;  %s46_s28 = int_to_ptr.vmem [resolvable:$true] %s45_s28 }
  0x24   :  { %p2475_p3 = scmp.lt.u32.totalorder %s2471_s8, %s3161_s4 }
  0x26   :  { %p2477_p4 = pnand %p2475_p3, %p2472_p2 }
  0x28   :  { %2480 = shalt.err (!%p2477_p4)
}
  0x29   :  { %s2481_s15 = scalar_lea.vmem %s46_s28, 1024  ;;  %p2486_p6 = scmp.lt.s32.totalorder %s46_s28, %s46_s28 }
  0x2a   :  { %p2482_p5 = scmp.ne.s32.totalorder %s46_s28, %s2481_s15  ;;  %p2487_p7 = scmp.lt.s32.totalorder %s2481_s15, %s2481_s15 }
  0x2c   :  { %p2488_p8 = por %p2487_p7, %p2486_p6 }
  0x2e   :  { %p2489_p9 = pnand %p2488_p8, %p2482_p5 }
  0x30   :  { %2492 = shalt.err (!%p2489_p9)
}
  0x31   :  { %s2512_s2 = smov 32   ;;  %s2513_s27 = smov 2  }
  0x32   :  { %51 = dma.hbm_to_vmem [thread:$0]  %s3161_s4, 1024, %s46_s28, [#allocation9], %s2512_s2, %s2512_s2, %s2513_s27  }
  0x33   :  { %2497 = dma.done.wait [#allocation7], 32768  }
  0x34   :  { %2498 = vsyncadd [#allocation7], 4294934528 }
  0x35   :  { %2499 = dma.done.wait [#allocation9], 33792  }
  0x36   :  { %2500 = vsyncadd [#allocation9], 4294933504  ;;  %v98_v0 = vld [vmem:[%s3157_s0] sm:$0xff]  ;;  %v100_v1 = vld [vmem:[%s3157_s0 + $0x8] sm:$0xff] }
  0x37   :  { %v102_v2 = vld [vmem:[%s3157_s0 + $0x10] sm:$0xff]  ;;  %99 = vst [vmem:[#allocation2] sm:$0xff] %v98_v0  ;;  %101 = vst [vmem:[#allocation2 + $0x8] sm:$0xff] %v100_v1  ;;  %v104_v3 = vld [vmem:[%s3157_s0 + $0x18] sm:$0xff] }
  0x38   :  { %103 = vst [vmem:[#allocation2 + $0x10] sm:$0xff] %v102_v2  ;;  %v106_v4 = vld [vmem:[%s3157_s0 + $0x20] sm:$0xff]  ;;  %v108_v5 = vld [vmem:[%s3157_s0 + $0x28] sm:$0xff]  ;;  %105 = vst [vmem:[#allocation2 + $0x18] sm:$0xff] %v104_v3 }
  0x39   :  { %107 = vst [vmem:[#allocation2 + $0x20] sm:$0xff] %v106_v4  ;;  %109 = vst [vmem:[#allocation2 + $0x28] sm:$0xff] %v108_v5  ;;  %v110_v6 = vld [vmem:[%s3157_s0 + $0x30] sm:$0xff]  ;;  %v112_v7 = vld [vmem:[%s3157_s0 + $0x38] sm:$0xff] }
  0x3a   :  { %111 = vst [vmem:[#allocation2 + $0x30] sm:$0xff] %v110_v6  ;;  %113 = vst [vmem:[#allocation2 + $0x38] sm:$0xff] %v112_v7 }
  0x3b   :  { %121 = vsyncadd [#allocation5], 1024 }
  0x3c   :  { %2501 = dma.done.wait [#allocation5], 1024 }
  0x3d   :  { %2502 = vsyncadd [#allocation5], 4294966272  ;;  %vm126_vm0 = vcmask 523264   ;;  %v2514_v8 = vmov 0.0   ;;  %v2633_v9 = vld [vmem:[%s3158_s1] sm:$0xff]  ;;  %s2635_s10 = smov 0  }
  0x3e   :  { %127 = vst.msk [vmem:[#allocation4] sm:$0xff] %vm126_vm0, %v2514_v8 }
  0x3f LB: > { %v2515_v10 = vmov 0   ;;  %s2121_s0 = sshll.u32 %s2505_s10, 6  ;;  %v158_v23 = vld [vmem:[#allocation2] sm:$0xff]  ;;  %v159_v26 = vld [vmem:[#allocation2 + $0x8] sm:$0xff]  ;;  %v171_v30 = vlaneseq  ;;  %s2031_s12 = sshll.u32 %s2505_s10, 1  ;;  %s2505_s10 = sphi %s2635_s10, %s133_s10  }
  0x40   : > { %265 = vmatprep.mubr.bf16.mxu0 %v2515_v10  ;;  %399 = vmatprep.mubr.bf16.mxu1 %v2515_v10  ;;  %s136_s11 = scalar_lea.vmem [#allocation6], %s2121_s0  ;;  %s146_s1 = scalar_lea.vmem [#allocation8], %s2121_s0  ;;  %v166_v28 = vpack.c.bf16 %v159_v26, %v158_v23  ;;  %v161_v26 = vld [vmem:[#allocation2 + $0x18] sm:$0xff] }
  0x41   : > { %v2185_v11 = vld [vmem:[%s136_s11 + $0x4] ss:$8 sps:$4 sm:$0xff]   ;;  %v2187_v12 = vld [vmem:[%s136_s11] ss:$8 sps:$4 sm:$0xff]   ;;  %v2188_v13 = vld [vmem:[%s136_s11 + $0x14] ss:$8 sps:$4 sm:$0xff]  }
  0x42   : > { %233 = vmatprep.subr.bf16.mxu0 %v2185_v11  ;;  %v2643_v14 = vld [vmem:[%s146_s1 + $0x4] ss:$8 sps:$4 sm:$0xff]   ;;  %v2190_v15 = vld [vmem:[%s136_s11 + $0x10] ss:$8 sps:$4 sm:$0xff]   ;;  %v2646_v17 = vld [vmem:[%s146_s1] ss:$8 sps:$4 sm:$0xff]  }
  0x43   : > { %234 = vmatpush1.bf16.msra.mxu0 %v2187_v12  ;;  %367 = vmatprep.subr.bf16.mxu1 %v2643_v14  ;;  %v2193_v16 = vld [vmem:[%s136_s11 + $0x24] ss:$8 sps:$4 sm:$0xff]   ;;  %v2648_v18 = vld [vmem:[%s146_s1 + $0x14] ss:$8 sps:$4 sm:$0xff]   ;;  %v2651_v19 = vld [vmem:[%s146_s1 + $0x10] ss:$8 sps:$4 sm:$0xff]  }
  0x44   : > { %235 = vmatprep.subr.bf16.mxu0 %v2188_v13  ;;  %368 = vmatpush1.bf16.msra.mxu1 %v2646_v17  ;;  %v2196_v20 = vld [vmem:[%s136_s11 + $0x20] ss:$8 sps:$4 sm:$0xff]   ;;  %v2199_v21 = vld [vmem:[%s136_s11 + $0x34] ss:$8 sps:$4 sm:$0xff]   ;;  %v2654_v22 = vld [vmem:[%s146_s1 + $0x24] ss:$8 sps:$4 sm:$0xff]  }
  0x45   : > { %369 = vmatprep.subr.bf16.mxu1 %v2648_v18  ;;  %v2657_v24 = vld [vmem:[%s146_s1 + $0x20] ss:$8 sps:$4 sm:$0xff]   ;;  %v2202_v25 = vld [vmem:[%s136_s11 + $0x30] ss:$8 sps:$4 sm:$0xff]   ;;  %v2660_v27 = vld [vmem:[%s146_s1 + $0x34] ss:$8 sps:$4 sm:$0xff]  }
  0x46   : > { %v2663_v29 = vld [vmem:[%s146_s1 + $0x30] ss:$8 sps:$4 sm:$0xff]   ;;  %v2690_v31 = vshrl.u32 %v171_v30, 7  ;;  %s156_s15 = scalar_lea.vmem [#allocation10], %s2031_s12  ;;  %s2516_s2 = smov 64   ;;  %v162_v30 = vld [vmem:[#allocation2 + $0x20] sm:$0xff] }
  0x47   : > { %236 = vmatpush1.bf16.msra.mxu0 %v2190_v15  ;;  %v157_v33 = vld [vmem:[%s156_s15] sm:$0x3]  ;;  %s133_s10 = sadd.s32 1, %s2505_s10  }
  0x48   : > { %237 = vmatprep.subr.bf16.mxu0 %v2193_v16  ;;  %370 = vmatpush1.bf16.msra.mxu1 %v2651_v19  ;;  %v173_v32 = vsub.s32 0, %v2690_v31  ;;  %v177_v34 = vsub.s32 1, %v2690_v31  ;;  %p130_p10 = scmp.ge.s32.totalorder %s133_s10, 31  }
  0x49   : > { %371 = vmatprep.subr.bf16.mxu1 %v2654_v22  ;;  %s2518_s27 = smov (%p130_p10), 64   ;;  %vm1266_vm1 = vcmp.eq.s32.totalorder (%p130_p10), %v2633_v9, 1  ;;  %vm1355_vm3 = vcmp.eq.s32.totalorder (%p130_p10), %v2633_v9, 2  ;;  %vm1444_vm5 = vcmp.eq.s32.totalorder (%p130_p10), %v2633_v9, 3  ;;  %vm1533_vm6 = vcmp.eq.s32.totalorder (%p130_p10), %v2633_v9, 4 }
  0x4a   : > { %v2696_v35 = vrot.slane %v157_v33, %v173_v32  ;;  %v2700_v36 = vrot.slane %v157_v33, %v177_v34  ;;  %v163_v33 = vld [vmem:[#allocation2 + $0x28] sm:$0xff]  ;;  %vm1622_vm9 = vcmp.eq.s32.totalorder (%p130_p10), %v2633_v9, 5  ;;  %vm1711_vm11 = vcmp.eq.s32.totalorder (%p130_p10), %v2633_v9, 6 }
  0x4b   : > { %238 = vmatpush1.bf16.msra.mxu0 %v2196_v20  ;;  %vm1800_vm12 = vcmp.eq.s32.totalorder (%p130_p10), %v2633_v9, 7  ;;  %vm1889_vm15 = vcmp.eq.s32.totalorder (%p130_p10), %v2633_v9, 8  ;;  %v1907_v9 = vld [vmem:[%s3162_s5] sm:$0xff] (%p130_p10) }
  0x4c   : > { %239 = vmatprep.subr.bf16.mxu0 %v2199_v21  ;;  %372 = vmatpush1.bf16.msra.mxu1 %v2657_v24 }
  0x4d   : > { %373 = vmatprep.subr.bf16.mxu1 %v2660_v27 }
  0x4f   : > { %240 = vmatpush1.bf16.msra.mxu0 %v2202_v25  ;;  %v160_v25 = vld [vmem:[#allocation2 + $0x10] sm:$0xff] }
  0x50   : > { %521 = vmatprep.subr.bf16.mxu0 %v2643_v14  ;;  %374 = vmatpush1.bf16.msra.mxu1 %v2663_v29 }
  0x51   : > { %444 = vmatprep.subr.bf16.mxu1 %v2643_v14 }
  0x52   : > { %2040 = vmatmul.mubr.msk.bf16.vlgmr.msra.gmra.mrb[0].mxu0 %vm126_vm0, %v166_v28  ;;  %v167_v28 = vpack.c.bf16 %v161_v26, %v160_v25 }
  0x53   : > { %522 = vmatpush1.bf16.msra.mxu0 %v2646_v17  ;;  %275 = vmatprep.mubr.bf16.mxu0 %v2515_v10 }
  0x54   : > { %523 = vmatprep.subr.bf16.mxu0 %v2648_v18  ;;  %400 = vmatmul.mubr.bf16.vlgmr.msra.gmra.mrb[0].mxu1 %v2515_v10 }
  0x55   : > { %445 = vmatpush1.bf16.msra.mxu1 %v2646_v17  ;;  %476 = vmatprep.mubr.bf16.mxu1 %v2515_v10 }
  0x56   : > { %446 = vmatprep.subr.bf16.mxu1 %v2648_v18 }
  0x57   : > { %524 = vmatpush1.bf16.msra.mxu0 %v2651_v19 }
  0x58   : > { %525 = vmatprep.subr.bf16.mxu0 %v2654_v22 }
  0x59   : > { %447 = vmatpush1.bf16.msra.mxu1 %v2651_v19 }
  0x5a   : > { %448 = vmatprep.subr.bf16.mxu1 %v2654_v22  ;;  %2041 = vmatmul.mubr.msk.bf16.gmra.mrb[4].mxu0 %vm126_vm0, %v167_v28 }
  0x5b   : > { %526 = vmatpush1.bf16.msra.mxu0 %v2657_v24  ;;  %285 = vmatprep.mubr.bf16.mxu0 %v2515_v10 }
  0x5c   : > { %527 = vmatprep.subr.bf16.mxu0 %v2660_v27 }
  0x5d   : > { %449 = vmatpush1.bf16.msra.mxu1 %v2657_v24 }
  0x5e   : > { %450 = vmatprep.subr.bf16.mxu1 %v2660_v27 }
  0x5f   : > { %528 = vmatpush1.bf16.msra.mxu0 %v2663_v29 }
  0x60   : > { %675 = vmatprep.subr.bf16.mxu0 %v2643_v14 }
  0x61   : > { %451 = vmatpush1.bf16.msra.mxu1 %v2663_v29 }
  0x62   : > { %598 = vmatprep.subr.bf16.mxu1 %v2643_v14 }
 0x125   : > { %v267_v37 = vpop.f32.mrb[0].mxu0 }
 0x126   : > { %v268_v38 = vadd.f32 %v267_v37, %v2696_v35  ;;  %v269_v39 = vpop.f32.mrb[1].mxu0  ;;  %v168_v37 = vpack.c.bf16 %v163_v33, %v162_v30 }
 0x127   : > { %v270_v40 = vadd.f32 %v269_v39, %v2700_v36  ;;  %v271_v41 = vpop.f32.mrb[2].mxu0  ;;  %v401_v44 = vpop.f32.mrb[0].mxu1  ;;  %v165_v39 = vld [vmem:[#allocation2 + $0x38] sm:$0xff] }
 0x128   : > { %v272_v42 = vadd.f32 %v271_v41, %v2696_v35  ;;  %v273_v43 = vpop.f32.mrb[3].mxu0  ;;  %v402_v46 = vadd.f32 %v401_v44, %v268_v38  ;;  %v403_v47 = vpop.f32.mrb[1].mxu1  ;;  %2042 = vmatmul.mubr.msk.bf16.gmra.mrb[8].mxu0 %vm126_vm0, %v168_v37  ;;  %v164_v38 = vld [vmem:[#allocation2 + $0x30] sm:$0xff] }
 0x129   : > { %v274_v45 = vadd.f32 %v273_v43, %v2700_v36  ;;  %v404_v48 = vadd.f32 %v403_v47, %v270_v40  ;;  %v405_v49 = vpop.f32.mrb[2].mxu1  ;;  %295 = vmatprep.mubr.bf16.mxu0 %v2515_v10  ;;  %v169_v40 = vpack.c.bf16 %v165_v39, %v164_v38 }
 0x12a   : > { %v2052_v50 = vmul.f32 -1.442695, %v402_v46  ;;  %v406_v51 = vpop.f32.mrb[3].mxu1 }
 0x12b   : > { %v2053_v57 = vmul.f32 -1.442695, %v404_v48 }
 0x12c   : > { %2209 = vpow2.f32 %v2052_v50 }
 0x12d   : > { %2211 = vtanh.f32 %v404_v48  ;;  %v277_v51 = vpop.f32.mrb[4].mxu0 }
 0x130   : > { %2043 = vmatmul.mubr.msk.bf16.gmra.mrb[12].mxu0 %vm126_vm0, %v169_v40 }
 0x131   : > { %553 = vmatprep.mubr.bf16.mxu0 %v2515_v10 }
 0x136   : > { %v2210_v52 = vpop.eup %2209 }
 0x137   : > { %v411_v53 = vadd.f32 1.0, %v2210_v52  ;;  %v2212_v54 = vpop.eup %2211  ;;  %v278_v52 = vadd.f32 %v277_v51, %v2696_v35 }
 0x139   : > { %2213 = vrcp.f32 %v411_v53  ;;  %v279_v53 = vpop.f32.mrb[5].mxu0 }
 0x13a   : > { %2215 = vpow2.f32 %v2053_v57 }
 0x143   : > { %v2214_v55 = vpop.eup %2213 }
 0x144   : > { %v422_v56 = vmul.f32 %v2214_v55, %v2212_v54  ;;  %v2216_v58 = vpop.eup %2215  ;;  %v421_v60 = vmul.f32 0.0, %v2214_v55  ;;  %v280_v54 = vadd.f32 %v279_v53, %v2700_v36  ;;  %v281_v55 = vpop.f32.mrb[6].mxu0 }
 0x145   : > { %v418_v59 = vadd.f32 1.0, %v2216_v58  ;;  %v283_v57 = vpop.f32.mrb[7].mxu0 }
 0x146   : > { %424 = vrot.lane.b32.xlu0 %v422_v56, %s2516_s2  ;;  %v2740_v56 = vadd.f32 %v281_v55, %v2696_v35  ;;  %v2743_v58 = vadd.f32 %v283_v57, %v2700_v36 }
 0x147   : > { %2217 = vrcp.f32 %v418_v59 }
 0x151   : > { %v2218_v63 = vpop.eup %2217 }
 0x1b8   : > { %v425_v61 = vpop.permute.xlu0 %424 }
 0x1b9   : > { %v427_v62 = vadd.f32 %v425_v61, %v421_v60 }
 0x1bb   : > { %2219 = vtanh.f32 %v427_v62 }
 0x1c5   : > { %v2220_v0 = vpop.eup %2219 }
 0x1c6   : > { %v2707_v1 = vmul.f32 %v2220_v0, %v2218_v63 }
 0x1c8   : > { %v435_v2 = vpack.c.bf16 %v2707_v1, %v2707_v1 }
 0x1ca   : > { %439 = vrot.lane.b32.xlu0 %v435_v2, %s2516_s2 }
 0x1fb   : > { %v287_v59 = vpop.f32.mrb[8].mxu0 }
 0x1fc   : > { %v2746_v60 = vadd.f32 %v287_v59, %v2696_v35  ;;  %v289_v61 = vpop.f32.mrb[9].mxu0 }
 0x1fd   : > { %v291_v63 = vpop.f32.mrb[10].mxu0 }
 0x1fe   : > { %v2752_v0 = vadd.f32 %v291_v63, %v2696_v35  ;;  %v293_v2 = vpop.f32.mrb[11].mxu0 }
 0x23c   : > { %v440_v3 = vpop.permute.xlu0 %439 }
 0x23d   : > { %2054 = vmatmul.mubr.msk.bf16.vlgmr.msra.gmra.mrb[4].mxu1 %vm126_vm0, %v440_v3  ;;  %v2755_v3 = vadd.f32 %v293_v2, %v2700_v36 }
 0x23e   : > { %599 = vmatpush1.bf16.msra.mxu1 %v2646_v17  ;;  %630 = vmatprep.mubr.bf16.mxu1 %v2515_v10 }
 0x23f   : > { %600 = vmatprep.subr.bf16.mxu1 %v2648_v18 }
 0x242   : > { %601 = vmatpush1.bf16.msra.mxu1 %v2651_v19 }
 0x243   : > { %602 = vmatprep.subr.bf16.mxu1 %v2654_v22 }
 0x246   : > { %603 = vmatpush1.bf16.msra.mxu1 %v2657_v24 }
 0x247   : > { %604 = vmatprep.subr.bf16.mxu1 %v2660_v27 }
 0x24a   : > { %605 = vmatpush1.bf16.msra.mxu1 %v2663_v29 }
 0x24b   : > { %752 = vmatprep.subr.bf16.mxu1 %v2643_v14 }
 0x310   : > { %v478_v4 = vpop.f32.mrb[4].mxu1 }
 0x311   : > { %v479_v5 = vadd.f32 %v478_v4, %v272_v42  ;;  %v480_v6 = vpop.f32.mrb[5].mxu1  ;;  %v297_v4 = vpop.f32.mrb[12].mxu0 }
 0x312   : > { %v482_v7 = vpop.f32.mrb[6].mxu1  ;;  %v481_v13 = vadd.f32 %v480_v6, %v274_v45  ;;  %v299_v6 = vpop.f32.mrb[13].mxu0 }
 0x313   : > { %v2055_v11 = vmul.f32 -1.442695, %v479_v5  ;;  %v483_v12 = vpop.f32.mrb[7].mxu1  ;;  %v2758_v5 = vadd.f32 %v297_v4, %v2696_v35  ;;  %v2761_v7 = vadd.f32 %v299_v6, %v2700_v36 }
 0x314   : > { %v2056_v41 = vmul.f32 -1.442695, %v481_v13 }
 0x315   : > { %2221 = vpow2.f32 %v2055_v11  ;;  %v301_v11 = vpop.f32.mrb[14].mxu0 }
 0x316   : > { %2223 = vtanh.f32 %v481_v13  ;;  %v2764_v12 = vadd.f32 %v301_v11, %v2696_v35  ;;  %v303_v13 = vpop.f32.mrb[15].mxu0 }
 0x31f   : > { %v2222_v15 = vpop.eup %2221 }
 0x320   : > { %v488_v16 = vadd.f32 1.0, %v2222_v15  ;;  %v2224_v20 = vpop.eup %2223  ;;  %v2767_v15 = vadd.f32 %v303_v13, %v2700_v36 }
 0x322   : > { %2225 = vrcp.f32 %v488_v16 }
 0x323   : > { %2227 = vpow2.f32 %v2056_v41 }
 0x32c   : > { %v2226_v21 = vpop.eup %2225 }
 0x32d   : > { %v499_v23 = vmul.f32 %v2226_v21, %v2224_v20  ;;  %v2228_v42 = vpop.eup %2227  ;;  %v498_v44 = vmul.f32 %v2226_v21, %v427_v62  ;;  %v2749_v62 = vadd.f32 %v289_v61, %v2700_v36 }
 0x32e   : > { %v495_v43 = vadd.f32 1.0, %v2228_v42 }
 0x32f   : > { %501 = vrot.lane.b32.xlu1 %v499_v23, %s2516_s2 }
 0x330   : > { %2229 = vrcp.f32 %v495_v43 }
 0x33a   : > { %v2230_v47 = vpop.eup %2229 }
 0x3a1   : > { %v502_v45 = vpop.permute.xlu1 %501 }
 0x3a2   : > { %v2729_v46 = vadd.f32 %v502_v45, %v498_v44 }
 0x3a4   : > { %2231 = vtanh.f32 %v2729_v46 }
 0x3ae   : > { %v2232_v48 = vpop.eup %2231 }
 0x3af   : > { %v2732_v49 = vmul.f32 %v2232_v48, %v2230_v47 }
 0x3b1   : > { %v512_v50 = vpack.c.bf16 %v2732_v49, %v2732_v49 }
 0x3b3   : > { %516 = vrot.lane.b32.xlu1 %v512_v50, %s2516_s2 }
 0x425   : > { %v517_v16 = vpop.permute.xlu1 %516 }
 0x426   : > { %2057 = vmatmul.mubr.msk.bf16.vlgmr.msra.gmra.mrb[16].mxu0 %vm126_vm0, %v517_v16 }
 0x427   : > { %676 = vmatpush1.bf16.msra.mxu0 %v2646_v17  ;;  %707 = vmatprep.mubr.bf16.mxu0 %v2515_v10 }
 0x428   : > { %677 = vmatprep.subr.bf16.mxu0 %v2648_v18 }
 0x42b   : > { %678 = vmatpush1.bf16.msra.mxu0 %v2651_v19 }
 0x42c   : > { %679 = vmatprep.subr.bf16.mxu0 %v2654_v22 }
 0x42f   : > { %680 = vmatpush1.bf16.msra.mxu0 %v2657_v24 }
 0x430   : > { %681 = vmatprep.subr.bf16.mxu0 %v2660_v27 }
 0x433   : > { %682 = vmatpush1.bf16.msra.mxu0 %v2663_v29 }
 0x434   : > { %829 = vmatprep.subr.bf16.mxu0 %v2643_v14 }
 0x4f9   : > { %v555_v35 = vpop.f32.mrb[16].mxu0 }
 0x4fa   : > { %v556_v36 = vadd.f32 %v555_v35, %v278_v52  ;;  %v557_v20 = vpop.f32.mrb[17].mxu0 }
 0x4fb   : > { %v559_v21 = vpop.f32.mrb[18].mxu0  ;;  %v558_v26 = vadd.f32 %v557_v20, %v280_v54 }
 0x4fc   : > { %v2058_v23 = vmul.f32 -1.442695, %v556_v36  ;;  %v560_v25 = vpop.f32.mrb[19].mxu0 }
 0x4fd   : > { %v2059_v39 = vmul.f32 -1.442695, %v558_v26 }
 0x4fe   : > { %2233 = vpow2.f32 %v2058_v23 }
 0x4ff   : > { %2235 = vtanh.f32 %v558_v26 }
 0x508   : > { %v2234_v28 = vpop.eup %2233 }
 0x509   : > { %v565_v30 = vadd.f32 1.0, %v2234_v28  ;;  %v2236_v33 = vpop.eup %2235 }
 0x50b   : > { %2237 = vrcp.f32 %v565_v30 }
 0x50c   : > { %2239 = vpow2.f32 %v2059_v39 }
 0x515   : > { %v2238_v37 = vpop.eup %2237 }
 0x516   : > { %v576_v38 = vmul.f32 %v2238_v37, %v2236_v33  ;;  %v2240_v40 = vpop.eup %2239  ;;  %v575_v42 = vmul.f32 %v2238_v37, %v2729_v46 }
 0x517   : > { %v572_v41 = vadd.f32 1.0, %v2240_v40 }
 0x518   : > { %578 = vrot.lane.b32.xlu0 %v576_v38, %s2516_s2 }
 0x519   : > { %2241 = vrcp.f32 %v572_v41 }
 0x523   : > { %v2242_v45 = vpop.eup %2241 }
 0x58a   : > { %v579_v43 = vpop.permute.xlu0 %578 }
 0x58b   : > { %v581_v44 = vadd.f32 %v579_v43, %v575_v42 }
 0x58d   : > { %2243 = vtanh.f32 %v581_v44 }
 0x597   : > { %v2244_v47 = vpop.eup %2243 }
 0x598   : > { %v2781_v48 = vmul.f32 %v2244_v47, %v2242_v45 }
 0x59a   : > { %v589_v50 = vpack.c.bf16 %v2781_v48, %v2781_v48 }
 0x59c   : > { %593 = vrot.lane.b32.xlu1 %v589_v50, %s2516_s2 }
 0x60e   : > { %v594_v51 = vpop.permute.xlu1 %593 }
 0x60f   : > { %2060 = vmatmul.mubr.msk.bf16.vlgmr.msra.gmra.mrb[8].mxu1 %vm126_vm0, %v594_v51 }
 0x610   : > { %753 = vmatpush1.bf16.msra.mxu1 %v2646_v17  ;;  %784 = vmatprep.mubr.bf16.mxu1 %v2515_v10 }
 0x611   : > { %754 = vmatprep.subr.bf16.mxu1 %v2648_v18 }
 0x614   : > { %755 = vmatpush1.bf16.msra.mxu1 %v2651_v19 }
 0x615   : > { %756 = vmatprep.subr.bf16.mxu1 %v2654_v22 }
 0x618   : > { %757 = vmatpush1.bf16.msra.mxu1 %v2657_v24 }
 0x619   : > { %758 = vmatprep.subr.bf16.mxu1 %v2660_v27 }
 0x61c   : > { %759 = vmatpush1.bf16.msra.mxu1 %v2663_v29 }
 0x61d   : > { %906 = vmatprep.subr.bf16.mxu1 %v2643_v14 }
 0x6e2   : > { %v632_v46 = vpop.f32.mrb[8].mxu1 }
 0x6e3   : > { %v633_v52 = vadd.f32 %v632_v46, %v2740_v56  ;;  %v634_v53 = vpop.f32.mrb[9].mxu1 }
 0x6e4   : > { %v636_v54 = vpop.f32.mrb[10].mxu1  ;;  %v635_v59 = vadd.f32 %v634_v53, %v2743_v58 }
 0x6e5   : > { %v2061_v55 = vmul.f32 -1.442695, %v633_v52  ;;  %v637_v57 = vpop.f32.mrb[11].mxu1 }
 0x6e6   : > { %v2062_v14 = vmul.f32 -1.442695, %v635_v59 }
 0x6e7   : > { %2245 = vpow2.f32 %v2061_v55 }
 0x6e8   : > { %2247 = vtanh.f32 %v635_v59 }
 0x6f1   : > { %v2246_v61 = vpop.eup %2245 }
 0x6f2   : > { %v642_v63 = vadd.f32 1.0, %v2246_v61  ;;  %v2248_v2 = vpop.eup %2247 }
 0x6f4   : > { %2249 = vrcp.f32 %v642_v63 }
 0x6f5   : > { %2251 = vpow2.f32 %v2062_v14 }
 0x6fe   : > { %v2250_v4 = vpop.eup %2249 }
 0x6ff   : > { %v653_v6 = vmul.f32 %v2250_v4, %v2248_v2  ;;  %v2252_v11 = vpop.eup %2251  ;;  %v652_v13 = vmul.f32 %v2250_v4, %v581_v44 }
 0x700   : > { %v649_v56 = vadd.f32 1.0, %v2252_v11 }
 0x701   : > { %655 = vrot.lane.b32.xlu0 %v653_v6, %s2516_s2 }
 0x702   : > { %2253 = vrcp.f32 %v649_v56 }
 0x70c   : > { %v2254_v36 = vpop.eup %2253 }
 0x773   : > { %v656_v16 = vpop.permute.xlu0 %655 }
 0x774   : > { %v658_v35 = vadd.f32 %v656_v16, %v652_v13 }
 0x776   : > { %2255 = vtanh.f32 %v658_v35 }
 0x780   : > { %v2256_v58 = vpop.eup %2255 }
 0x781   : > { %v2799_v20 = vmul.f32 %v2256_v58, %v2254_v36 }
 0x783   : > { %v666_v21 = vpack.c.bf16 %v2799_v20, %v2799_v20 }
 0x785   : > { %670 = vrot.lane.b32.xlu1 %v666_v21, %s2516_s2 }
 0x7f7   : > { %v671_v23 = vpop.permute.xlu1 %670 }
 0x7f8   : > { %2063 = vmatmul.mubr.msk.bf16.vlgmr.msra.gmra.mrb[20].mxu0 %vm126_vm0, %v671_v23 }
 0x7f9   : > { %830 = vmatpush1.bf16.msra.mxu0 %v2646_v17  ;;  %861 = vmatprep.mubr.bf16.mxu0 %v2515_v10 }
 0x7fa   : > { %831 = vmatprep.subr.bf16.mxu0 %v2648_v18 }
 0x7fd   : > { %832 = vmatpush1.bf16.msra.mxu0 %v2651_v19 }
 0x7fe   : > { %833 = vmatprep.subr.bf16.mxu0 %v2654_v22 }
 0x801   : > { %834 = vmatpush1.bf16.msra.mxu0 %v2657_v24 }
 0x802   : > { %835 = vmatprep.subr.bf16.mxu0 %v2660_v27 }
 0x805   : > { %836 = vmatpush1.bf16.msra.mxu0 %v2663_v29 }
 0x8cb   : > { %v709_v25 = vpop.f32.mrb[20].mxu0 }
 0x8cc   : > { %v710_v26 = vadd.f32 %v709_v25, %v2746_v60  ;;  %v711_v28 = vpop.f32.mrb[21].mxu0 }
 0x8cd   : > { %v713_v30 = vpop.f32.mrb[22].mxu0  ;;  %v712_v38 = vadd.f32 %v711_v28, %v2749_v62 }
 0x8ce   : > { %v2064_v33 = vmul.f32 -1.442695, %v710_v26  ;;  %v714_v37 = vpop.f32.mrb[23].mxu0 }
 0x8cf   : > { %v2065_v44 = vmul.f32 -1.442695, %v712_v38 }
 0x8d0   : > { %2257 = vpow2.f32 %v2064_v33 }
 0x8d1   : > { %2259 = vtanh.f32 %v712_v38 }
 0x8da   : > { %v2258_v39 = vpop.eup %2257 }
 0x8db   : > { %v719_v40 = vadd.f32 1.0, %v2258_v39  ;;  %v2260_v41 = vpop.eup %2259 }
 0x8dd   : > { %2261 = vrcp.f32 %v719_v40 }
 0x8de   : > { %2263 = vpow2.f32 %v2065_v44 }
 0x8e7   : > { %v2262_v42 = vpop.eup %2261 }
 0x8e8   : > { %v730_v43 = vmul.f32 %v2262_v42, %v2260_v41  ;;  %v2264_v45 = vpop.eup %2263  ;;  %v729_v47 = vmul.f32 %v2262_v42, %v658_v35 }
 0x8e9   : > { %v726_v60 = vadd.f32 1.0, %v2264_v45 }
 0x8ea   : > { %732 = vrot.lane.b32.xlu0 %v730_v43, %s2516_s2 }
 0x8eb   : > { %2265 = vrcp.f32 %v726_v60 }
 0x8f5   : > { %v2266_v46 = vpop.eup %2265 }
 0x95c   : > { %v733_v50 = vpop.permute.xlu0 %732 }
 0x95d   : > { %v735_v51 = vadd.f32 %v733_v50, %v729_v47 }
 0x95f   : > { %2267 = vtanh.f32 %v735_v51 }
 0x969   : > { %v2268_v62 = vpop.eup %2267 }
 0x96a   : > { %v2816_v52 = vmul.f32 %v2268_v62, %v2266_v46 }
 0x96c   : > { %v743_v53 = vpack.c.bf16 %v2816_v52, %v2816_v52 }
 0x96e   : > { %747 = vrot.lane.b32.xlu1 %v743_v53, %s2516_s2 }
 0x9e0   : > { %v748_v54 = vpop.permute.xlu1 %747 }
 0x9e1   : > { %2066 = vmatmul.mubr.msk.bf16.vlgmr.msra.gmra.mrb[12].mxu1 %vm126_vm0, %v748_v54 }
 0x9e2   : > { %907 = vmatpush1.bf16.msra.mxu1 %v2646_v17  ;;  %938 = vmatprep.mubr.bf16.mxu1 %v2515_v10 }
 0x9e3   : > { %908 = vmatprep.subr.bf16.mxu1 %v2648_v18 }
 0x9e6   : > { %909 = vmatpush1.bf16.msra.mxu1 %v2651_v19 }
 0x9e7   : > { %910 = vmatprep.subr.bf16.mxu1 %v2654_v22 }
 0x9ea   : > { %911 = vmatpush1.bf16.msra.mxu1 %v2657_v24 }
 0x9eb   : > { %912 = vmatprep.subr.bf16.mxu1 %v2660_v27 }
 0x9ee   : > { %913 = vmatpush1.bf16.msra.mxu1 %v2663_v29 }
 0xab4   : > { %v786_v55 = vpop.f32.mrb[12].mxu1 }
 0xab5   : > { %v787_v57 = vadd.f32 %v786_v55, %v2752_v0  ;;  %v788_v59 = vpop.f32.mrb[13].mxu1 }
 0xab6   : > { %v790_v61 = vpop.f32.mrb[14].mxu1  ;;  %v789_v10 = vadd.f32 %v788_v59, %v2755_v3 }
 0xab7   : > { %v2067_v17 = vmul.f32 -1.442695, %v787_v57  ;;  %v791_v63 = vpop.f32.mrb[15].mxu1 }
 0xab8   : > { %v2068_v27 = vmul.f32 -1.442695, %v789_v10 }
 0xab9   : > { %2269 = vpow2.f32 %v2067_v17 }
 0xaba   : > { %2271 = vtanh.f32 %v789_v10 }
 0xac3   : > { %v2270_v18 = vpop.eup %2269 }
 0xac4   : > { %v796_v19 = vadd.f32 1.0, %v2270_v18  ;;  %v2272_v22 = vpop.eup %2271 }
 0xac6   : > { %2273 = vrcp.f32 %v796_v19 }
 0xac7   : > { %2275 = vpow2.f32 %v2068_v27 }
 0xad0   : > { %v2274_v24 = vpop.eup %2273 }
 0xad1   : > { %v807_v2 = vmul.f32 %v2274_v24, %v2272_v22  ;;  %v2276_v29 = vpop.eup %2275  ;;  %v806_v4 = vmul.f32 %v2274_v24, %v735_v51 }
 0xad2   : > { %v803_v0 = vadd.f32 1.0, %v2276_v29 }
 0xad3   : > { %809 = vrot.lane.b32.xlu0 %v807_v2, %s2516_s2 }
 0xad4   : > { %2277 = vrcp.f32 %v803_v0 }
 0xade   : > { %v2278_v11 = vpop.eup %2277 }
 0xb45   : > { %v810_v6 = vpop.permute.xlu0 %809 }
 0xb46   : > { %v812_v14 = vadd.f32 %v810_v6, %v806_v4  ;;  %v2307_v6 = vld [vmem:[#allocation6 + $0x7c4] ss:$8 sps:$4 sm:$0xff] (%p130_p10)  }
 0xb47   :  { %1069 = vmatprep.subr.bf16.mxu0 (%p130_p10), %v2307_v6 }
 0xb48   : > { %2279 = vtanh.f32 %v812_v14 }
 0xb52   : > { %v2280_v3 = vpop.eup %2279 }
 0xb53   : > { %v2833_v56 = vmul.f32 %v2280_v3, %v2278_v11  ;;  %v2517_v11 = vmov (%p130_p10), 0   ;;  %v2310_v3 = vld [vmem:[#allocation6 + $0x7d4] ss:$8 sps:$4 sm:$0xff] (%p130_p10)  }
 0xb54   :  { %2305 = vset.pattern.permute.xlu0 (%p130_p10), %v2517_v11  ;;  %2306 = vset.pattern.permute.xlu1 (%p130_p10), %v2517_v11 }
 0xb55   : > { %v820_v13 = vpack.c.bf16 %v2833_v56, %v2833_v56 }
 0xb57   : > { %824 = vrot.lane.b32.xlu1 %v820_v13, %s2516_s2  ;;  %v2875_v13 = vld [vmem:[#allocation8 + $0x7c4] ss:$8 sps:$4 sm:$0xff] (%p130_p10)  }
 0xb58   :  { %1203 = vmatprep.subr.bf16.mxu1 (%p130_p10), %v2875_v13 }
 0xbc9   : > { %v825_v16 = vpop.permute.xlu1 %824 }
 0xbca   : > { %2069 = vmatmul.mubr.msk.bf16.vlgmr.msra.gmra.mrb[24].mxu0 %vm126_vm0, %v825_v16  ;;  %v2315_v16 = vld [vmem:[#allocation6 + $0x7e4] ss:$8 sps:$4 sm:$0xff] (%p130_p10)  }
 0xbcb   :  { %1101 = vmatprep.mubr.bf16.mxu0 (%p130_p10), %v2517_v11 }
 0xc9d   : > { %v863_v35 = vpop.f32.mrb[24].mxu0 }
 0xc9e   : > { %v864_v36 = vadd.f32 %v863_v35, %v2758_v5  ;;  %v865_v58 = vpop.f32.mrb[25].mxu0  ;;  %v2878_v35 = vld [vmem:[#allocation8 + $0x7c0] ss:$8 sps:$4 sm:$0xff] (%p130_p10)  }
 0xc9f   : > { %v867_v21 = vpop.f32.mrb[26].mxu0  ;;  %v866_v26 = vadd.f32 %v865_v58, %v2761_v7  ;;  %v2318_v58 = vld [vmem:[#allocation6 + $0x7e0] ss:$8 sps:$4 sm:$0xff] (%p130_p10)  }
 0xca0   : > { %v2070_v23 = vmul.f32 -1.442695, %v864_v36  ;;  %v868_v25 = vpop.f32.mrb[27].mxu0  ;;  %v2882_v36 = vld [vmem:[#allocation8 + $0x7d4] ss:$8 sps:$4 sm:$0xff] (%p130_p10)  }
 0xca1   : > { %v2071_v39 = vmul.f32 -1.442695, %v866_v26  ;;  %v2321_v21 = vld [vmem:[#allocation6 + $0x7f4] ss:$8 sps:$4 sm:$0xff] (%p130_p10)   ;;  %v2887_v25 = vld [vmem:[#allocation8 + $0x7e4] ss:$8 sps:$4 sm:$0xff] (%p130_p10)  }
 0xca2   : > { %2281 = vpow2.f32 %v2070_v23  ;;  %v2884_v23 = vld [vmem:[#allocation8 + $0x7d0] ss:$8 sps:$4 sm:$0xff] (%p130_p10)  }
 0xca3   : > { %2283 = vtanh.f32 %v866_v26  ;;  %v2324_v26 = vld [vmem:[#allocation6 + $0x7f0] ss:$8 sps:$4 sm:$0xff] (%p130_p10)  }
 0xcac   : > { %v2282_v28 = vpop.eup %2281 }
 0xcad   : > { %v873_v30 = vadd.f32 1.0, %v2282_v28  ;;  %v2284_v33 = vpop.eup %2283  ;;  %v2890_v28 = vld [vmem:[#allocation8 + $0x7e0] ss:$8 sps:$4 sm:$0xff] (%p130_p10)  }
 0xcaf   : > { %2285 = vrcp.f32 %v873_v30 }
 0xcb0   : > { %2287 = vpow2.f32 %v2071_v39  ;;  %v2896_v39 = vld [vmem:[#allocation8 + $0x7f0] ss:$8 sps:$4 sm:$0xff] (%p130_p10)  }
 0xcb9   : > { %v2286_v37 = vpop.eup %2285 }
 0xcba   : > { %v884_v38 = vmul.f32 %v2286_v37, %v2284_v33  ;;  %v2288_v40 = vpop.eup %2287  ;;  %v883_v41 = vmul.f32 %v2286_v37, %v812_v14  ;;  %v2309_v14 = vld [vmem:[#allocation6 + $0x7c0] ss:$8 sps:$4 sm:$0xff] (%p130_p10)   ;;  %v2893_v37 = vld [vmem:[#allocation8 + $0x7f4] ss:$8 sps:$4 sm:$0xff] (%p130_p10)  }
 0xcbb   : > { %v880_v5 = vadd.f32 1.0, %v2288_v40  ;;  %1070 = vmatpush1.bf16.msra.mxu0 (%p130_p10), %v2309_v14  ;;  %v993_v40 = vld [vmem:[#allocation10 + $0x3e] sm:$0x3] (%p130_p10) }
 0xcbc   : > { %886 = vrot.lane.b32.xlu0 %v884_v38, %s2516_s2  ;;  %1071 = vmatprep.subr.bf16.mxu0 (%p130_p10), %v2310_v3 }
 0xcbd   : > { %2289 = vrcp.f32 %v880_v5  ;;  %v2924_v5 = vrot.slane (%p130_p10), %v993_v40, %v173_v32 }
 0xcc7   : > { %v2290_v44 = vpop.eup %2289 }
 0xd2e   : > { %v887_v42 = vpop.permute.xlu0 %886 }
 0xd2f   : > { %v889_v43 = vadd.f32 %v887_v42, %v883_v41  ;;  %v2928_v41 = vrot.slane (%p130_p10), %v993_v40, %v177_v34 }
 0xd31   : > { %2291 = vtanh.f32 %v889_v43 }
 0xd3b   : > { %v2292_v7 = vpop.eup %2291 }
 0xd3c   : > { %v891_v45 = vmul.f32 %v2292_v7, %v2290_v44 }
 0xd3e   : > { %v897_v60 = vpack.c.bf16 %v891_v45, %v891_v45 }
 0xd40   : > { %901 = vrot.lane.b32.xlu1 %v897_v60, %s2516_s2 }
 0xd44   : > { %431 = vrot.lane.b32.xlu1 %v2707_v1, %s2516_s2 }
 0xd48   : > { %585 = vrot.lane.b32.xlu1 %v2781_v48, %s2516_s2 }
 0xd4c   : > { %739 = vrot.lane.b32.xlu1 %v2816_v52, %s2516_s2 }
 0xd50   : > { %893 = vrot.lane.b32.xlu1 %v891_v45, %s2516_s2 }
 0xdb2   : > { %v902_v47 = vpop.permute.xlu1 %901 }
 0xdb3   : > { %2072 = vmatmul.mubr.msk.bf16.vlgmr.msra.gmra.mrb[16].mxu1 %vm126_vm0, %v902_v47 }
 0xdb4   :  { %1235 = vmatprep.mubr.bf16.mxu1 (%p130_p10), %v2517_v11  ;;  %1204 = vmatpush1.bf16.msra.mxu1 (%p130_p10), %v2878_v35 }
 0xdb5   :  { %1205 = vmatprep.subr.bf16.mxu1 (%p130_p10), %v2882_v36 }
 0xdb6   : > { %v432_v50 = vpop.permute.xlu1 %431 }
 0xdb7   : > { %434 = vst.msk [vmem:[#allocation2] sm:$0xff] %vm126_vm0, %v432_v50 }
 0xdb8   :  { %1206 = vmatpush1.bf16.msra.mxu1 (%p130_p10), %v2884_v23 }
 0xdb9   :  { %1207 = vmatprep.subr.bf16.mxu1 (%p130_p10), %v2887_v25 }
 0xdba   : > { %v586_v51 = vpop.permute.xlu1 %585 }
 0xdbb   : > { %588 = vst.msk [vmem:[#allocation2 + $0x10] sm:$0xff] %vm126_vm0, %v586_v51 }
 0xdbc   :  { %1208 = vmatpush1.bf16.msra.mxu1 (%p130_p10), %v2890_v28 }
 0xdbd   :  { %1209 = vmatprep.subr.bf16.mxu1 (%p130_p10), %v2893_v37 }
 0xdbe   : > { %v740_v46 = vpop.permute.xlu1 %739  ;;  %v994_v30 = vld [vmem:[#allocation2] sm:$0xff] (%p130_p10) }
 0xdbf   : > { %742 = vst.msk [vmem:[#allocation2 + $0x20] sm:$0xff] %vm126_vm0, %v740_v46 }
 0xdc0   :  { %1210 = vmatpush1.bf16.msra.mxu1 (%p130_p10), %v2896_v39 }
 0xdc1   :  { %1292 = vmatprep.subr.bf16.mxu1 (%p130_p10), %v2875_v13 }
 0xdc2   : > { %v894_v1 = vpop.permute.xlu1 %893 }
 0xdc3   : > { %896 = vst.msk [vmem:[#allocation2 + $0x30] sm:$0xff] %vm126_vm0, %v894_v1  ;;  %1236 = vmatmul.mubr.bf16.vlgmr.msra.gmra.mrb[0].mxu1 (%p130_p10), %v2517_v11 }
 0xdc4   :  { %1293 = vmatpush1.bf16.msra.mxu1 (%p130_p10), %v2878_v35  ;;  %1324 = vmatprep.mubr.bf16.mxu1 (%p130_p10), %v2517_v11 }
 0xdc5   :  { %1294 = vmatprep.subr.bf16.mxu1 (%p130_p10), %v2882_v36 }
 0xdc8   :  { %1295 = vmatpush1.bf16.msra.mxu1 (%p130_p10), %v2884_v23 }
 0xdc9   :  { %1296 = vmatprep.subr.bf16.mxu1 (%p130_p10), %v2887_v25 }
 0xdcc   :  { %1297 = vmatpush1.bf16.msra.mxu1 (%p130_p10), %v2890_v28 }
 0xdcd   :  { %1298 = vmatprep.subr.bf16.mxu1 (%p130_p10), %v2893_v37 }
 0xdd0   :  { %1299 = vmatpush1.bf16.msra.mxu1 (%p130_p10), %v2896_v39 }
 0xdd1   :  { %1470 = vmatprep.subr.bf16.mxu1 (%p130_p10), %v2875_v13 }
 0xe86   : > { %v940_v48 = vpop.f32.mrb[16].mxu1 }
 0xe87   : > { %v941_v62 = vadd.f32 %v940_v48, %v2764_v12  ;;  %v942_v52 = vpop.f32.mrb[17].mxu1 }
 0xe88   : > { %v944_v53 = vpop.f32.mrb[18].mxu1  ;;  %v943_v57 = vadd.f32 %v942_v52, %v2767_v15 }
 0xe89   : > { %v2073_v54 = vmul.f32 -1.442695, %v941_v62  ;;  %v945_v55 = vpop.f32.mrb[19].mxu1 }
 0xe8a   : > { %v2074_v12 = vmul.f32 -1.442695, %v943_v57 }
 0xe8b   : > { %2293 = vpow2.f32 %v2073_v54 }
 0xe8c   : > { %2295 = vtanh.f32 %v943_v57 }
 0xe95   : > { %v2294_v59 = vpop.eup %2293 }
 0xe96   : > { %v950_v61 = vadd.f32 1.0, %v2294_v59  ;;  %v2296_v17 = vpop.eup %2295  ;;  %v1237_v50 = vpop.f32.mrb[0].mxu1 (%p130_p10) }
 0xe97   :  { %v1239_v32 = vpop.f32.mrb[1].mxu1 (%p130_p10) }
 0xe98   : > { %2297 = vrcp.f32 %v950_v61  ;;  %v1241_v48 = vpop.f32.mrb[2].mxu1 (%p130_p10) }
 0xe99   : > { %2299 = vpow2.f32 %v2074_v12  ;;  %v1242_v34 = vpop.f32.mrb[3].mxu1 (%p130_p10) }
 0xea2   : > { %v2298_v63 = vpop.eup %2297 }
 0xea3   : > { %v961_v10 = vmul.f32 %v2298_v63, %v2296_v17  ;;  %v2300_v15 = vpop.eup %2299  ;;  %v960_v19 = vmul.f32 %v2298_v63, %v889_v43 }
 0xea4   : > { %v957_v18 = vadd.f32 1.0, %v2300_v15 }
 0xea5   : > { %963 = vrot.lane.b32.xlu0 %v961_v10, %s2516_s2 }
 0xea6   : > { %2301 = vrcp.f32 %v957_v18 }
 0xea9   : > { %508 = vrot.lane.b32.xlu0 %v2732_v49, %s2516_s2 }
 0xead   : > { %662 = vrot.lane.b32.xlu0 %v2799_v20, %s2516_s2 }
 0xeb0   : > { %v2302_v49 = vpop.eup %2301 }
 0xeb1   : > { %816 = vrot.lane.b32.xlu0 %v2833_v56, %s2516_s2  ;;  %v2312_v56 = vld [vmem:[#allocation6 + $0x7d0] ss:$8 sps:$4 sm:$0xff] (%p130_p10)  }
 0xeb2   :  { %1072 = vmatpush1.bf16.msra.mxu0 (%p130_p10), %v2312_v56 }
 0xeb3   :  { %1073 = vmatprep.subr.bf16.mxu0 (%p130_p10), %v2315_v16  ;;  %v996_v16 = vld [vmem:[#allocation2 + $0x10] sm:$0xff] (%p130_p10) }
 0xeb6   :  { %1074 = vmatpush1.bf16.msra.mxu0 (%p130_p10), %v2318_v58 }
 0xeb7   :  { %1075 = vmatprep.subr.bf16.mxu0 (%p130_p10), %v2321_v21 }
 0xeba   :  { %1076 = vmatpush1.bf16.msra.mxu0 (%p130_p10), %v2324_v26  ;;  %v998_v26 = vld [vmem:[#allocation2 + $0x20] sm:$0xff] (%p130_p10) }
 0xebb   :  { %1381 = vmatprep.subr.bf16.mxu0 (%p130_p10), %v2875_v13 }
 0xf17   : > { %v964_v22 = vpop.permute.xlu0 %963 }
 0xf18   : > { %v966_v24 = vadd.f32 %v964_v22, %v960_v19 }
 0xf1a   : > { %2303 = vtanh.f32 %v966_v24 }
 0xf1b   : > { %v509_v2 = vpop.permute.xlu0 %508 }
 0xf1c   : > { %511 = vst.msk [vmem:[#allocation2 + $0x8] sm:$0xff] %vm126_vm0, %v509_v2 }
 0xf1f   : > { %v663_v27 = vpop.permute.xlu0 %662 }
 0xf20   : > { %665 = vst.msk [vmem:[#allocation2 + $0x18] sm:$0xff] %vm126_vm0, %v663_v27 }
 0xf23   : > { %v817_v20 = vpop.permute.xlu0 %816  ;;  %v995_v33 = vld [vmem:[#allocation2 + $0x8] sm:$0xff] (%p130_p10) }
 0xf24   : > { %v2304_v29 = vpop.eup %2303  ;;  %819 = vst.msk [vmem:[#allocation2 + $0x28] sm:$0xff] %vm126_vm0, %v817_v20  ;;  %v1002_v38 = vpack.c.bf16 (%p130_p10), %v995_v33, %v994_v30 }
 0xf25   : > { %v968_v0 = vmul.f32 %v2304_v29, %v2302_v49 }
 0xf26   :  { %2083 = vmatmul.mubr.msk.bf16.vlgmr.msra.gmra.mrb[0].mxu0 (%p130_p10), %vm126_vm0, %v1002_v38  ;;  %v1000_v38 = vld [vmem:[#allocation2 + $0x30] sm:$0xff] (%p130_p10) }
 0xf27   : > { %970 = vrot.lane.b32.xlu0 %v968_v0, %s2516_s2  ;;  %1382 = vmatpush1.bf16.msra.mxu0 (%p130_p10), %v2878_v35  ;;  %v997_v58 = vld [vmem:[#allocation2 + $0x18] sm:$0xff] (%p130_p10) }
 0xf28   :  { %1111 = vmatprep.mubr.bf16.mxu0 (%p130_p10), %v2517_v11  ;;  %1383 = vmatprep.subr.bf16.mxu0 (%p130_p10), %v2882_v36  ;;  %v1003_v21 = vpack.c.bf16 (%p130_p10), %v997_v58, %v996_v16 }
 0xf2b   :  { %1384 = vmatpush1.bf16.msra.mxu0 (%p130_p10), %v2884_v23  ;;  %v999_v30 = vld [vmem:[#allocation2 + $0x28] sm:$0xff] (%p130_p10) }
 0xf2c   :  { %1385 = vmatprep.subr.bf16.mxu0 (%p130_p10), %v2887_v25  ;;  %v1004_v33 = vpack.c.bf16 (%p130_p10), %v999_v30, %v998_v26 }
 0xf2e   :  { %2084 = vmatmul.mubr.msk.bf16.gmra.mrb[4].mxu0 (%p130_p10), %vm126_vm0, %v1003_v21 }
 0xf2f   :  { %1386 = vmatpush1.bf16.msra.mxu0 (%p130_p10), %v2890_v28  ;;  %1121 = vmatprep.mubr.bf16.mxu0 (%p130_p10), %v2517_v11 }
 0xf30   :  { %1387 = vmatprep.subr.bf16.mxu0 (%p130_p10), %v2893_v37 }
 0xf33   :  { %1388 = vmatpush1.bf16.msra.mxu0 (%p130_p10), %v2896_v39 }
 0xf34   :  { %1559 = vmatprep.subr.bf16.mxu0 (%p130_p10), %v2875_v13 }
 0xf36   :  { %2085 = vmatmul.mubr.msk.bf16.gmra.mrb[8].mxu0 (%p130_p10), %vm126_vm0, %v1004_v33 }
 0xf37   :  { %1131 = vmatprep.mubr.bf16.mxu0 (%p130_p10), %v2517_v11 }
 0xf94   :  { %132 = sbr.rel (!%p130_p10) target bundleno = 63 (0x3f), region = 111 }
 0xf99   : > { %v971_v4 = vpop.permute.xlu0 %970 }
 0xf9a   : > { %973 = vst.msk [vmem:[#allocation2 + $0x38] sm:$0xff] %vm126_vm0, %v971_v4 }
 0xfa1   :  { %v1001_v40 = vld [vmem:[#allocation2 + $0x38] sm:$0xff] }
 0xff9   :  { %v1103_v42 = vpop.f32.mrb[0].mxu0 }
 0xffa   :  { %v1104_v43 = vadd.f32 %v1103_v42, %v2924_v5  ;;  %v1105_v44 = vpop.f32.mrb[1].mxu0  ;;  %v1005_v42 = vpack.c.bf16 %v1001_v40, %v1000_v38 }
 0xffb   :  { %v1106_v7 = vadd.f32 %v1105_v44, %v2928_v41  ;;  %v1107_v45 = vpop.f32.mrb[2].mxu0 }
 0xffc   :  { %v1108_v60 = vadd.f32 %v1107_v45, %v2924_v5  ;;  %v1109_v47 = vpop.f32.mrb[3].mxu0  ;;  %v1238_v46 = vadd.f32 %v1237_v50, %v1104_v43  ;;  %2086 = vmatmul.mubr.msk.bf16.gmra.mrb[12].mxu0 %vm126_vm0, %v1005_v42 }
 0xffd   :  { %v1110_v51 = vadd.f32 %v1109_v47, %v2928_v41  ;;  %v1240_v1 = vadd.f32 %v1239_v32, %v1106_v7  ;;  %1413 = vmatprep.mubr.bf16.mxu0 %v2517_v11 }
 0xffe   :  { %v2095_v31 = vmul.f32 -1.442695, %v1238_v46 }
 0xfff   :  { %v2096_v57 = vmul.f32 -1.442695, %v1240_v1 }
0x1000   :  { %2331 = vpow2.f32 %v2095_v31 }
0x1001   :  { %2333 = vtanh.f32 %v1240_v1  ;;  %v1113_v1 = vpop.f32.mrb[4].mxu0 }
0x1002   :  { %v1114_v48 = vadd.f32 %v1113_v1, %v2924_v5  ;;  %v1115_v31 = vpop.f32.mrb[5].mxu0 }
0x1003   :  { %v1116_v34 = vadd.f32 %v1115_v31, %v2928_v41 }
0x100a   :  { %v2332_v62 = vpop.eup %2331 }
0x100b   :  { %v1247_v52 = vadd.f32 1.0, %v2332_v62  ;;  %v2334_v53 = vpop.eup %2333  ;;  %v1117_v62 = vpop.f32.mrb[6].mxu0 }
0x100d   :  { %2335 = vrcp.f32 %v1247_v52  ;;  %v2968_v52 = vadd.f32 %v1117_v62, %v2924_v5 }
0x100e   :  { %2337 = vpow2.f32 %v2096_v57 }
0x1017   :  { %v2336_v54 = vpop.eup %2335 }
0x1018   :  { %v1258_v55 = vmul.f32 %v2336_v54, %v2334_v53  ;;  %v2338_v59 = vpop.eup %2337  ;;  %v1257_v17 = vmul.f32 0.0, %v2336_v54  ;;  %v1119_v53 = vpop.f32.mrb[7].mxu0 }
0x1019   :  { %v1254_v61 = vadd.f32 1.0, %v2338_v59  ;;  %v2971_v54 = vadd.f32 %v1119_v53, %v2928_v41 }
0x101a   :  { %1260 = vrot.lane.b32.xlu0 %v1258_v55, %s2518_s27  ;;  %v1123_v55 = vpop.f32.mrb[8].mxu0 }
0x101b   :  { %2339 = vrcp.f32 %v1254_v61  ;;  %v2974_v57 = vadd.f32 %v1123_v55, %v2924_v5  ;;  %v1125_v59 = vpop.f32.mrb[9].mxu0 }
0x101c   :  { %v2977_v61 = vadd.f32 %v1125_v59, %v2928_v41 }
0x1025   :  { %v2340_v12 = vpop.eup %2339 }
0x108c   :  { %v1261_v63 = vpop.permute.xlu0 %1260 }
0x108d   :  { %v1263_v10 = vadd.f32 %v1261_v63, %v1257_v17  ;;  %v1127_v17 = vpop.f32.mrb[10].mxu0 }
0x108e   :  { %v2980_v63 = vadd.f32 %v1127_v17, %v2924_v5 }
0x108f   :  { %2341 = vtanh.f32 %v1263_v10 }
0x1099   :  { %v2342_v15 = vpop.eup %2341 }
0x109a   :  { %v2935_v18 = vmul.f32 %v2342_v15, %v2340_v12 }
0x109c   :  { %v1283_v19 = vpack.c.bf16 %v2935_v18, %v2935_v18 }
0x109e   :  { %1287 = vrot.lane.b32.xlu0 %v1283_v19, %s2518_s27 }
0x1110   :  { %v1288_v22 = vpop.permute.xlu0 %1287 }
0x1111   :  { %2097 = vmatmul.mubr.msk.bf16.vlgmr.msra.gmra.mrb[4].mxu1 %vm126_vm0, %v1288_v22 }
0x1112   :  { %1471 = vmatpush1.bf16.msra.mxu1 %v2878_v35  ;;  %1502 = vmatprep.mubr.bf16.mxu1 %v2517_v11 }
0x1113   :  { %1472 = vmatprep.subr.bf16.mxu1 %v2882_v36 }
0x1116   :  { %1473 = vmatpush1.bf16.msra.mxu1 %v2884_v23 }
0x1117   :  { %1474 = vmatprep.subr.bf16.mxu1 %v2887_v25 }
0x111a   :  { %1475 = vmatpush1.bf16.msra.mxu1 %v2890_v28 }
0x111b   :  { %1476 = vmatprep.subr.bf16.mxu1 %v2893_v37 }
0x111e   :  { %1477 = vmatpush1.bf16.msra.mxu1 %v2896_v39 }
0x111f   :  { %1648 = vmatprep.subr.bf16.mxu1 %v2875_v13 }
0x11e4   :  { %v1326_v24 = vpop.f32.mrb[4].mxu1 }
0x11e5   :  { %v1327_v2 = vadd.f32 %v1326_v24, %v1108_v60  ;;  %v1328_v27 = vpop.f32.mrb[5].mxu1 }
0x11e6   :  { %v1330_v49 = vpop.f32.mrb[6].mxu1  ;;  %v1329_v0 = vadd.f32 %v1328_v27, %v1110_v51 }
0x11e7   :  { %v2098_v20 = vmul.f32 -1.442695, %v1327_v2  ;;  %v1331_v29 = vpop.f32.mrb[7].mxu1 }
0x11e8   :  { %v2099_v43 = vmul.f32 -1.442695, %v1329_v0 }
0x11e9   :  { %2343 = vpow2.f32 %v2098_v20 }
0x11ea   :  { %2345 = vtanh.f32 %v1329_v0 }
0x11f3   :  { %v2344_v4 = vpop.eup %2343 }
0x11f4   :  { %v1336_v6 = vadd.f32 1.0, %v2344_v4  ;;  %v2346_v14 = vpop.eup %2345 }
0x11f6   :  { %2347 = vrcp.f32 %v1336_v6 }
0x11f7   :  { %2349 = vpow2.f32 %v2099_v43 }
0x1200   :  { %v2348_v3 = vpop.eup %2347 }
0x1201   :  { %v1347_v56 = vmul.f32 %v2348_v3, %v2346_v14  ;;  %v2350_v44 = vpop.eup %2349  ;;  %v1346_v45 = vmul.f32 %v2348_v3, %v1263_v10  ;;  %v1129_v10 = vpop.f32.mrb[11].mxu0 }
0x1202   :  { %v1343_v7 = vadd.f32 1.0, %v2350_v44  ;;  %v2983_v12 = vadd.f32 %v1129_v10, %v2928_v41  ;;  %v1133_v15 = vpop.f32.mrb[12].mxu0 }
0x1203   :  { %1349 = vrot.lane.b32.xlu1 %v1347_v56, %s2518_s27  ;;  %v2986_v19 = vadd.f32 %v1133_v15, %v2924_v5  ;;  %v1135_v22 = vpop.f32.mrb[13].mxu0 }
0x1204   :  { %2351 = vrcp.f32 %v1343_v7  ;;  %v2989_v24 = vadd.f32 %v1135_v22, %v2928_v41  ;;  %v1137_v2 = vpop.f32.mrb[14].mxu0 }
0x1205   :  { %v2992_v27 = vadd.f32 %v1137_v2, %v2924_v5  ;;  %v1139_v49 = vpop.f32.mrb[15].mxu0 }
0x1206   :  { %v2995_v20 = vadd.f32 %v1139_v49, %v2928_v41 }
0x120e   :  { %v2352_v50 = vpop.eup %2351 }
0x1275   :  { %v1350_v60 = vpop.permute.xlu1 %1349 }
0x1276   :  { %v2957_v47 = vadd.f32 %v1350_v60, %v1346_v45 }
0x1278   :  { %2353 = vtanh.f32 %v2957_v47 }
0x1282   :  { %v2354_v51 = vpop.eup %2353 }
0x1283   :  { %v2960_v46 = vmul.f32 %v2354_v51, %v2352_v50 }
0x1285   :  { %v1372_v32 = vpack.c.bf16 %v2960_v46, %v2960_v46 }
0x1287   :  { %1376 = vrot.lane.b32.xlu1 %v1372_v32, %s2518_s27 }
0x12f9   :  { %v1377_v29 = vpop.permute.xlu1 %1376 }
0x12fa   :  { %2100 = vmatmul.mubr.msk.bf16.vlgmr.msra.gmra.mrb[16].mxu0 %vm126_vm0, %v1377_v29 }
0x12fb   :  { %1560 = vmatpush1.bf16.msra.mxu0 %v2878_v35  ;;  %1591 = vmatprep.mubr.bf16.mxu0 %v2517_v11 }
0x12fc   :  { %1561 = vmatprep.subr.bf16.mxu0 %v2882_v36 }
0x12ff   :  { %1562 = vmatpush1.bf16.msra.mxu0 %v2884_v23 }
0x1300   :  { %1563 = vmatprep.subr.bf16.mxu0 %v2887_v25 }
0x1303   :  { %1564 = vmatpush1.bf16.msra.mxu0 %v2890_v28 }
0x1304   :  { %1565 = vmatprep.subr.bf16.mxu0 %v2893_v37 }
0x1307   :  { %1566 = vmatpush1.bf16.msra.mxu0 %v2896_v39 }
0x1308   :  { %1737 = vmatprep.subr.bf16.mxu0 %v2875_v13 }
0x13cd   :  { %v1415_v5 = vpop.f32.mrb[16].mxu0 }
0x13ce   :  { %v1416_v41 = vadd.f32 %v1415_v5, %v1114_v48  ;;  %v1417_v0 = vpop.f32.mrb[17].mxu0 }
0x13cf   :  { %v1419_v4 = vpop.f32.mrb[18].mxu0  ;;  %v1418_v3 = vadd.f32 %v1417_v0, %v1116_v34 }
0x13d0   :  { %v2101_v6 = vmul.f32 -1.442695, %v1416_v41  ;;  %v1420_v14 = vpop.f32.mrb[19].mxu0 }
0x13d1   :  { %v2102_v30 = vmul.f32 -1.442695, %v1418_v3 }
0x13d2   :  { %2355 = vpow2.f32 %v2101_v6 }
0x13d3   :  { %2357 = vtanh.f32 %v1418_v3 }
0x13dc   :  { %v2356_v56 = vpop.eup %2355 }
0x13dd   :  { %v1425_v16 = vadd.f32 1.0, %v2356_v56  ;;  %v2358_v58 = vpop.eup %2357 }
0x13df   :  { %2359 = vrcp.f32 %v1425_v16 }
0x13e0   :  { %2361 = vpow2.f32 %v2102_v30 }
0x13e9   :  { %v2360_v21 = vpop.eup %2359 }
0x13ea   :  { %v1436_v26 = vmul.f32 %v2360_v21, %v2358_v58  ;;  %v2362_v33 = vpop.eup %2361  ;;  %v1435_v40 = vmul.f32 %v2360_v21, %v2957_v47 }
0x13eb   :  { %v1432_v38 = vadd.f32 1.0, %v2362_v33 }
0x13ec   :  { %1438 = vrot.lane.b32.xlu0 %v1436_v26, %s2518_s27 }
0x13ed   :  { %2363 = vrcp.f32 %v1432_v38 }
0x13f7   :  { %v2364_v44 = vpop.eup %2363 }
0x145e   :  { %v1439_v42 = vpop.permute.xlu0 %1438 }
0x145f   :  { %v1441_v43 = vadd.f32 %v1439_v42, %v1435_v40 }
0x1461   :  { %2365 = vtanh.f32 %v1441_v43 }
0x146b   :  { %v2366_v7 = vpop.eup %2365 }
0x146c   :  { %v3009_v45 = vmul.f32 %v2366_v7, %v2364_v44 }
0x146e   :  { %v1461_v60 = vpack.c.bf16 %v3009_v45, %v3009_v45 }
0x1470   :  { %1465 = vrot.lane.b32.xlu1 %v1461_v60, %s2518_s27 }
0x14e2   :  { %v1466_v50 = vpop.permute.xlu1 %1465 }
0x14e3   :  { %2103 = vmatmul.mubr.msk.bf16.vlgmr.msra.gmra.mrb[8].mxu1 %vm126_vm0, %v1466_v50 }
0x14e4   :  { %1649 = vmatpush1.bf16.msra.mxu1 %v2878_v35  ;;  %1680 = vmatprep.mubr.bf16.mxu1 %v2517_v11 }
0x14e5   :  { %1650 = vmatprep.subr.bf16.mxu1 %v2882_v36 }
0x14e8   :  { %1651 = vmatpush1.bf16.msra.mxu1 %v2884_v23 }
0x14e9   :  { %1652 = vmatprep.subr.bf16.mxu1 %v2887_v25 }
0x14ec   :  { %1653 = vmatpush1.bf16.msra.mxu1 %v2890_v28 }
0x14ed   :  { %1654 = vmatprep.subr.bf16.mxu1 %v2893_v37 }
0x14f0   :  { %1655 = vmatpush1.bf16.msra.mxu1 %v2896_v39 }
0x14f1   :  { %1826 = vmatprep.subr.bf16.mxu1 %v2875_v13 }
0x15b6   :  { %v1504_v47 = vpop.f32.mrb[8].mxu1 }
0x15b7   :  { %v1505_v51 = vadd.f32 %v1504_v47, %v2968_v52  ;;  %v1506_v32 = vpop.f32.mrb[9].mxu1 }
0x15b8   :  { %v1508_v1 = vpop.f32.mrb[10].mxu1  ;;  %v1507_v34 = vadd.f32 %v1506_v32, %v2971_v54 }
0x15b9   :  { %v2104_v48 = vmul.f32 -1.442695, %v1505_v51  ;;  %v1509_v31 = vpop.f32.mrb[11].mxu1  ;;  %v1267_v51 = vld [vmem:[#allocation4] sm:$0xff] }
0x15ba   :  { %v2105_v13 = vmul.f32 -1.442695, %v1507_v34 }
0x15bb   :  { %2367 = vpow2.f32 %v2104_v48 }
0x15bc   :  { %2369 = vtanh.f32 %v1507_v34 }
0x15c5   :  { %v2368_v62 = vpop.eup %2367 }
0x15c6   :  { %v1514_v53 = vadd.f32 1.0, %v2368_v62  ;;  %v2370_v55 = vpop.eup %2369 }
0x15c8   :  { %2371 = vrcp.f32 %v1514_v53 }
0x15c9   :  { %2373 = vpow2.f32 %v2105_v13 }
0x15d2   :  { %v2372_v59 = vpop.eup %2371 }
0x15d3   :  { %v1525_v17 = vmul.f32 %v2372_v59, %v2370_v55  ;;  %v2374_v10 = vpop.eup %2373  ;;  %v1524_v15 = vmul.f32 %v2372_v59, %v1441_v43 }
0x15d4   :  { %v1521_v52 = vadd.f32 1.0, %v2374_v10 }
0x15d5   :  { %1527 = vrot.lane.b32.xlu0 %v1525_v17, %s2518_s27 }
0x15d6   :  { %2375 = vrcp.f32 %v1521_v52 }
0x15e0   :  { %v2376_v49 = vpop.eup %2375 }
0x1647   :  { %v1528_v22 = vpop.permute.xlu0 %1527 }
0x1648   :  { %v1530_v2 = vadd.f32 %v1528_v22, %v1524_v15 }
0x164a   :  { %2377 = vtanh.f32 %v1530_v2 }
0x1654   :  { %v2378_v54 = vpop.eup %2377 }
0x1655   :  { %v3027_v29 = vmul.f32 %v2378_v54, %v2376_v49 }
0x1657   :  { %v1550_v5 = vpack.c.bf16 %v3027_v29, %v3027_v29 }
0x1659   :  { %1554 = vrot.lane.b32.xlu1 %v1550_v5, %s2518_s27  ;;  %v1446_v5 = vsel %vm1444_vm5, 1, %v2517_v11 }
0x16cb   :  { %v1555_v41 = vpop.permute.xlu1 %1554 }
0x16cc   :  { %2106 = vmatmul.mubr.msk.bf16.vlgmr.msra.gmra.mrb[20].mxu0 %vm126_vm0, %v1555_v41 }
0x16cd   :  { %1738 = vmatpush1.bf16.msra.mxu0 %v2878_v35  ;;  %1769 = vmatprep.mubr.bf16.mxu0 %v2517_v11 }
0x16ce   :  { %1739 = vmatprep.subr.bf16.mxu0 %v2882_v36 }
0x16d1   :  { %1740 = vmatpush1.bf16.msra.mxu0 %v2884_v23 }
0x16d2   :  { %1741 = vmatprep.subr.bf16.mxu0 %v2887_v25 }
0x16d5   :  { %1742 = vmatpush1.bf16.msra.mxu0 %v2890_v28 }
0x16d6   :  { %1743 = vmatprep.subr.bf16.mxu0 %v2893_v37 }
0x16d9   :  { %1744 = vmatpush1.bf16.msra.mxu0 %v2896_v39 }
0x179f   :  { %v1593_v0 = vpop.f32.mrb[20].mxu0 }
0x17a0   :  { %v1594_v4 = vadd.f32 %v1593_v0, %v2974_v57  ;;  %v1595_v6 = vpop.f32.mrb[21].mxu0  ;;  %v1268_v57 = vsel %vm1266_vm1, 1, %v2517_v11  ;;  %vm2520_vm1 = vmmov 0  }
0x17a1   :  { %v1597_v14 = vpop.f32.mrb[22].mxu0  ;;  %v1596_v16 = vadd.f32 %v1595_v6, %v2977_v61 }
0x17a2   :  { %v2107_v3 = vmul.f32 -1.442695, %v1594_v4  ;;  %v1598_v56 = vpop.f32.mrb[23].mxu0 }
0x17a3   :  { %v2108_v38 = vmul.f32 -1.442695, %v1596_v16 }
0x17a4   :  { %2379 = vpow2.f32 %v2107_v3  ;;  %v1535_v3 = vsel %vm1533_vm6, 1, %v2517_v11 }
0x17a5   :  { %2381 = vtanh.f32 %v1596_v16 }
0x17ae   :  { %v2380_v58 = vpop.eup %2379 }
0x17af   :  { %v1603_v21 = vadd.f32 1.0, %v2380_v58  ;;  %v2382_v26 = vpop.eup %2381 }
0x17b1   :  { %2383 = vrcp.f32 %v1603_v21 }
0x17b2   :  { %2385 = vpow2.f32 %v2108_v38 }
0x17bb   :  { %v2384_v30 = vpop.eup %2383 }
0x17bc   :  { %v1614_v33 = vmul.f32 %v2384_v30, %v2382_v26  ;;  %v2386_v40 = vpop.eup %2385  ;;  %v1613_v43 = vmul.f32 %v2384_v30, %v1530_v2 }
0x17bd   :  { %v1610_v42 = vadd.f32 1.0, %v2386_v40 }
0x17be   :  { %1616 = vrot.lane.b32.xlu0 %v1614_v33, %s2518_s27 }
0x17bf   :  { %2387 = vrcp.f32 %v1610_v42 }
0x17c2   :  { %1270 = vperm.xlu0 %2305, %v1268_v57  }
0x17c9   :  { %v2388_v7 = vpop.eup %2387 }
0x1830   :  { %v1617_v61 = vpop.permute.xlu0 %1616 }
0x1831   :  { %v1619_v44 = vadd.f32 %v1617_v61, %v1613_v43 }
0x1833   :  { %2389 = vtanh.f32 %v1619_v44 }
0x183d   :  { %v2390_v60 = vpop.eup %2389 }
0x183e   :  { %v3046_v50 = vmul.f32 %v2390_v60, %v2388_v7 }
0x1840   :  { %v1639_v47 = vpack.c.bf16 %v3046_v50, %v3046_v50 }
0x1841   :  { %v1271_v32 = vpop.permute.xlu0 %1270 }
0x1842   :  { %1643 = vrot.lane.b32.xlu1 %v1639_v47, %s2518_s27  ;;  %vm1272_vm2 = vcmp.eq.s32.totalorder %v1271_v32, 1  ;;  %v1624_v32 = vsel %vm1622_vm9, 1, %v2517_v11 }
0x1846   :  { %1274 = vrot.lane.b32.xlu1 %v1267_v51, %s2518_s27 }
0x18b4   :  { %v1644_v1 = vpop.permute.xlu1 %1643 }
0x18b5   :  { %2109 = vmatmul.mubr.msk.bf16.vlgmr.msra.gmra.mrb[12].mxu1 %vm126_vm0, %v1644_v1 }
0x18b6   :  { %1827 = vmatpush1.bf16.msra.mxu1 %v2878_v35  ;;  %1858 = vmatprep.mubr.bf16.mxu1 %v2517_v11  ;;  %v1357_v35 = vsel %vm1355_vm3, 1, %v2517_v11  ;;  %vm1995_vm3 = vcmask 31744  }
0x18b7   :  { %1828 = vmatprep.subr.bf16.mxu1 %v2882_v36 }
0x18b8   :  { %v1275_v48 = vpop.permute.xlu1 %1274 }
0x18b9   :  { %v1277_v31 = vsel %vm1272_vm2, %v2935_v18, %v1275_v48 }
0x18ba   :  { %1279 = vrot.lane.b32.xlu1 %v1277_v31, %s2518_s27  ;;  %1829 = vmatpush1.bf16.msra.mxu1 %v2884_v23 }
0x18bb   :  { %1830 = vmatprep.subr.bf16.mxu1 %v2887_v25 }
0x18be   :  { %1831 = vmatpush1.bf16.msra.mxu1 %v2890_v28  ;;  %1359 = vperm.xlu1 %2306, %v1357_v35  }
0x18bf   :  { %1832 = vmatprep.subr.bf16.mxu1 %v2893_v37 }
0x18c2   :  { %1833 = vmatpush1.bf16.msra.mxu1 %v2896_v39 }
0x192c   :  { %v1280_v36 = vpop.permute.xlu1 %1279 }
0x192d   :  { %1282 = vst.msk [vmem:[#allocation4] sm:$0xff] %vm126_vm0, %v1280_v36 }
0x1934   :  { %v1356_v13 = vld [vmem:[#allocation4] sm:$0xff] }
0x193d   :  { %v1360_v22 = vpop.permute.xlu1 %1359 }
0x193e   :  { %vm1361_vm4 = vcmp.eq.s32.totalorder %v1360_v22, 1 }
0x1988   :  { %v1682_v18 = vpop.f32.mrb[12].mxu1 }
0x1989   :  { %v1683_v34 = vadd.f32 %v1682_v18, %v2980_v63  ;;  %v1684_v23 = vpop.f32.mrb[13].mxu1 }
0x198a   :  { %v1686_v62 = vpop.f32.mrb[14].mxu1  ;;  %v1685_v28 = vadd.f32 %v1684_v23, %v2983_v12 }
0x198b   :  { %v2110_v25 = vmul.f32 -1.442695, %v1683_v34  ;;  %v1687_v53 = vpop.f32.mrb[15].mxu1 }
0x198c   :  { %v2111_v63 = vmul.f32 -1.442695, %v1685_v28 }
0x198d   :  { %2391 = vpow2.f32 %v2110_v25 }
0x198e   :  { %2393 = vtanh.f32 %v1685_v28 }
0x1997   :  { %v2392_v37 = vpop.eup %2391 }
0x1998   :  { %v1692_v39 = vadd.f32 1.0, %v2392_v37  ;;  %v2394_v55 = vpop.eup %2393 }
0x199a   :  { %2395 = vrcp.f32 %v1692_v39 }
0x199b   :  { %2397 = vpow2.f32 %v2111_v63  ;;  %v1802_v63 = vsel %vm1800_vm12, 1, %v2517_v11 }
0x19a4   :  { %v2396_v59 = vpop.eup %2395 }
0x19a5   :  { %v1703_v17 = vmul.f32 %v2396_v59, %v2394_v55  ;;  %v2398_v10 = vpop.eup %2397  ;;  %v1702_v15 = vmul.f32 %v2396_v59, %v1619_v44  ;;  %v1713_v55 = vsel %vm1711_vm11, 1, %v2517_v11 }
0x19a6   :  { %v1699_v52 = vadd.f32 1.0, %v2398_v10 }
0x19a7   :  { %1705 = vrot.lane.b32.xlu0 %v1703_v17, %s2518_s27 }
0x19a8   :  { %2399 = vrcp.f32 %v1699_v52 }
0x19ab   :  { %1363 = vrot.lane.b32.xlu0 %v1356_v13, %s2518_s27 }
0x19b2   :  { %v2400_v41 = vpop.eup %2399 }
0x1a19   :  { %v1706_v2 = vpop.permute.xlu0 %1705 }
0x1a1a   :  { %v1708_v12 = vadd.f32 %v1706_v2, %v1702_v15 }
0x1a1c   :  { %2401 = vtanh.f32 %v1708_v12 }
0x1a1d   :  { %v1364_v49 = vpop.permute.xlu0 %1363 }
0x1a1e   :  { %v1366_v54 = vsel %vm1361_vm4, %v2960_v46, %v1364_v49 }
0x1a1f   :  { %1368 = vrot.lane.b32.xlu1 %v1366_v54, %s2518_s27 }
0x1a23   :  { %1448 = vperm.xlu1 %2306, %v1446_v5  }
0x1a26   :  { %v2402_v0 = vpop.eup %2401 }
0x1a27   :  { %v3074_v4 = vmul.f32 %v2402_v0, %v2400_v41 }
0x1a29   :  { %v1728_v6 = vpack.c.bf16 %v3074_v4, %v3074_v4 }
0x1a2b   :  { %1732 = vrot.lane.b32.xlu0 %v1728_v6, %s2518_s27 }
0x1a91   :  { %v1369_v14 = vpop.permute.xlu1 %1368 }
0x1a92   :  { %1371 = vst.msk [vmem:[#allocation4] sm:$0xff] %vm126_vm0, %v1369_v14 }
0x1a99   :  { %v1445_v46 = vld [vmem:[#allocation4] sm:$0xff] }
0x1a9a   :  { %1452 = vrot.lane.b32.xlu0 %v1445_v46, %s2518_s27 }
0x1a9d   :  { %v1733_v56 = vpop.permute.xlu0 %1732 }
0x1a9e   :  { %2112 = vmatmul.mubr.msk.bf16.vlgmr.msra.gmra.mrb[24].mxu0 %vm126_vm0, %v1733_v56  ;;  %1537 = vperm.xlu0 %2305, %v1535_v3  }
0x1a9f   :  { %2148 = vmatprep.mubr.msk.f32.mxu0 %vm2520_vm1, %v2514_v8  ;;  %v2118_v8 = vld [vmem:[%s3163_s6] ss:$0 sm:$0xff] }
0x1aa2   :  { %v1449_v16 = vpop.permute.xlu1 %1448 }
0x1aa3   :  { %vm1450_vm7 = vcmp.eq.s32.totalorder %v1449_v16, 1 }
0x1b0c   :  { %v1453_v58 = vpop.permute.xlu0 %1452 }
0x1b0d   :  { %v1455_v21 = vsel %vm1450_vm7, %v3009_v45, %v1453_v58 }
0x1b0e   :  { %1457 = vrot.lane.b32.xlu1 %v1455_v21, %s2518_s27 }
0x1b1d   :  { %v1538_v47 = vpop.permute.xlu0 %1537 }
0x1b1e   :  { %vm1539_vm8 = vcmp.eq.s32.totalorder %v1538_v47, 1  ;;  %v1911_v47 = vld [vmem:[%s3162_s5 + $0x20] sm:$0xff] }
0x1b71   :  { %v1771_v26 = vpop.f32.mrb[24].mxu0 }
0x1b72   :  { %v1772_v30 = vadd.f32 %v1771_v26, %v2986_v19  ;;  %v1773_v33 = vpop.f32.mrb[25].mxu0 }
0x1b73   :  { %v1775_v57 = vpop.f32.mrb[26].mxu0  ;;  %v1774_v42 = vadd.f32 %v1773_v33, %v2989_v24 }
0x1b74   :  { %v2113_v38 = vmul.f32 -1.442695, %v1772_v30  ;;  %v1776_v40 = vpop.f32.mrb[27].mxu0  ;;  %v1891_v30 = vsel %vm1889_vm15, 1, %v2517_v11  ;;  %v1909_v11 = vld [vmem:[%s3162_s5 + $0x10] sm:$0xff] }
0x1b75   :  { %v2114_v1 = vmul.f32 -1.442695, %v1774_v42 }
0x1b76   :  { %2403 = vpow2.f32 %v2113_v38 }
0x1b77   :  { %2405 = vtanh.f32 %v1774_v42 }
0x1b80   :  { %v2404_v43 = vpop.eup %2403  ;;  %v1458_v61 = vpop.permute.xlu1 %1457 }
0x1b81   :  { %v1781_v44 = vadd.f32 1.0, %v2404_v43  ;;  %1460 = vst.msk [vmem:[#allocation4] sm:$0xff] %vm126_vm0, %v1458_v61  ;;  %v2406_v7 = vpop.eup %2405  ;;  %v1908_v43 = vld [vmem:[%s3162_s5 + $0x8] sm:$0xff]  ;;  %v2519_v61 = vmov 0.0|0.0  }
0x1b82   :  { %2151 = vmatprep.subr.bf16.mxu0 %v2519_v61 }
0x1b83   :  { %2407 = vrcp.f32 %v1781_v44  ;;  %v2152_v44 = vpack.c.bf16 %v1908_v43, %v1907_v9 }
0x1b84   :  { %2409 = vpow2.f32 %v2114_v1  ;;  %v1914_v1 = vld [vmem:[%s3162_s5 + $0x38] sm:$0xff] }
0x1b85   :  { %2153 = vmatpush3.bf16.msra.mxu0 %v2152_v44 }
0x1b86   :  { %2154 = vmatprep.subr.bf16.mxu0 %v2519_v61 }
0x1b88   :  { %v1534_v45 = vld [vmem:[#allocation4] sm:$0xff] }
0x1b89   :  { %1541 = vrot.lane.b32.xlu1 %v1534_v45, %s2518_s27  ;;  %v1910_v45 = vld [vmem:[%s3162_s5 + $0x18] sm:$0xff] }
0x1b8d   :  { %v2408_v60 = vpop.eup %2407 }
0x1b8e   :  { %v1792_v19 = vmul.f32 %v2408_v60, %v2406_v7  ;;  %v1791_v31 = vmul.f32 %v2408_v60, %v1708_v12  ;;  %v2410_v35 = vpop.eup %2409  ;;  %v2155_v60 = vpack.c.bf16 %v1910_v45, %v1909_v11 }
0x1b8f   :  { %v1788_v18 = vadd.f32 1.0, %v2410_v35 }
0x1b90   :  { %1794 = vrot.lane.b32.xlu1 %v1792_v19, %s2518_s27  ;;  %2156 = vmatpush3.bf16.msra.mxu0 %v2155_v60 }
0x1b91   :  { %2157 = vmatprep.subr.bf16.mxu0 %v2519_v61 }
0x1bfb   :  { %v1542_v51 = vpop.permute.xlu1 %1541 }
0x1bfc   :  { %v1544_v24 = vsel %vm1539_vm8, %v3027_v29, %v1542_v51  ;;  %v1912_v51 = vld [vmem:[%s3162_s5 + $0x28] sm:$0xff] }
0x1bfd   :  { %1546 = vrot.lane.b32.xlu0 %v1544_v24, %s2518_s27  ;;  %v1913_v24 = vld [vmem:[%s3162_s5 + $0x30] sm:$0xff] }
0x1c01   :  { %1626 = vperm.xlu0 %2305, %v1624_v32   ;;  %v2158_v32 = vpack.c.bf16 %v1912_v51, %v1911_v47 }
0x1c02   :  { %v1795_v48 = vpop.permute.xlu1 %1794 }
0x1c03   :  { %v3095_v36 = vadd.f32 %v1795_v48, %v1791_v31  ;;  %2159 = vmatpush3.bf16.msra.mxu0 %v2158_v32  ;;  %v2161_v48 = vpack.c.bf16 %v1914_v1, %v1913_v24 }
0x1c04   :  { %2160 = vmatprep.subr.bf16.mxu0 %v2519_v61 }
0x1c05   :  { %2411 = vtanh.f32 %v3095_v36 }
0x1c06   :  { %2413 = vrcp.f32 %v1788_v18 }
0x1c07   :  { %2162 = vmatpush3.bf16.msra.mxu0 %v2161_v48 }
0x1c0f   :  { %v2412_v29 = vpop.eup %2411 }
0x1c10   :  { %v2414_v23 = vpop.eup %2413 }
0x1c11   :  { %v1799_v62 = vmul.f32 %v2414_v23, %v2412_v29 }
0x1c13   :  { %v1817_v53 = vpack.c.bf16 %v1799_v62, %v1799_v62 }
0x1c6f   :  { %v1547_v34 = vpop.permute.xlu0 %1546 }
0x1c70   :  { %1549 = vst.msk [vmem:[#allocation4] sm:$0xff] %vm126_vm0, %v1547_v34 }
0x1c77   :  { %v1623_v25 = vld [vmem:[#allocation4] sm:$0xff] }
0x1c78   :  { %1630 = vrot.lane.b32.xlu1 %v1623_v25, %s2518_s27 }
0x1c7c   :  { %1821 = vrot.lane.b32.xlu1 %v1817_v53, %s2518_s27 }
0x1c80   :  { %v1627_v28 = vpop.permute.xlu0 %1626 }
0x1c81   :  { %vm1628_vm10 = vcmp.eq.s32.totalorder %v1627_v28, 1 }
0x1cea   :  { %v1631_v37 = vpop.permute.xlu1 %1630 }
0x1ceb   :  { %v1633_v39 = vsel %vm1628_vm10, %v3046_v50, %v1631_v37 }
0x1cec   :  { %1635 = vrot.lane.b32.xlu0 %v1633_v39, %s2518_s27 }
0x1cee   :  { %v1822_v59 = vpop.permute.xlu1 %1821 }
0x1cef   :  { %2115 = vmatmul.mubr.msk.bf16.vlgmr.msra.gmra.mrb[16].mxu1 %vm126_vm0, %v1822_v59 }
0x1cf0   :  { %1715 = vperm.xlu0 %2305, %v1713_v55  }
0x1d5e   :  { %v1636_v17 = vpop.permute.xlu0 %1635 }
0x1d5f   :  { %1638 = vst.msk [vmem:[#allocation4] sm:$0xff] %vm126_vm0, %v1636_v17 }
0x1d66   :  { %v1712_v13 = vld [vmem:[#allocation4] sm:$0xff] }
0x1d67   :  { %1719 = vrot.lane.b32.xlu1 %v1712_v13, %s2518_s27 }
0x1d6b   :  { %1804 = vperm.xlu1 %2306, %v1802_v63  }
0x1d6f   :  { %v1716_v5 = vpop.permute.xlu0 %1715 }
0x1d70   :  { %vm1717_vm13 = vcmp.eq.s32.totalorder %v1716_v5, 1 }
0x1dc2   :  { %v1860_v50 = vpop.f32.mrb[16].mxu1 }
0x1dc3   :  { %v1861_v10 = vadd.f32 %v1860_v50, %v2992_v27  ;;  %v1862_v52 = vpop.f32.mrb[17].mxu1 }
0x1dc4   :  { %v1864_v15 = vpop.f32.mrb[18].mxu1  ;;  %v1863_v12 = vadd.f32 %v1862_v52, %v2995_v20 }
0x1dc5   :  { %v2116_v22 = vmul.f32 -1.442695, %v1861_v10  ;;  %v1865_v2 = vpop.f32.mrb[19].mxu1 }
0x1dc6   :  { %v2117_v20 = vmul.f32 -1.442695, %v1863_v12 }
0x1dc7   :  { %2415 = vpow2.f32 %v2116_v22 }
0x1dc8   :  { %2417 = vtanh.f32 %v1863_v12 }
0x1dd1   :  { %v2416_v49 = vpop.eup %2415 }
0x1dd2   :  { %v1870_v54 = vadd.f32 1.0, %v2416_v49  ;;  %v2418_v6 = vpop.eup %2417 }
0x1dd4   :  { %2419 = vrcp.f32 %v1870_v54 }
0x1dd5   :  { %2421 = vpow2.f32 %v2117_v20 }
0x1dd9   :  { %v1720_v41 = vpop.permute.xlu1 %1719 }
0x1dda   :  { %v1722_v0 = vsel %vm1717_vm13, %v3074_v4, %v1720_v41 }
0x1ddb   :  { %1724 = vrot.lane.b32.xlu0 %v1722_v0, %s2518_s27 }
0x1dde   :  { %v2420_v27 = vpop.eup %2419 }
0x1ddf   :  { %v1881_v14 = vmul.f32 %v2420_v27, %v2418_v6  ;;  %v2422_v16 = vpop.eup %2421  ;;  %v1880_v26 = vmul.f32 %v2420_v27, %v3095_v36 }
0x1de0   :  { %v1877_v21 = vadd.f32 1.0, %v2422_v16 }
0x1de2   :  { %2423 = vrcp.f32 %v1877_v21 }
0x1dea   :  { %v1805_v56 = vpop.permute.xlu1 %1804 }
0x1deb   :  { %vm1806_vm14 = vcmp.eq.s32.totalorder %v1805_v56, 1 }
0x1dec   :  { %v2424_v38 = vpop.eup %2423 }
0x1e4d   :  { %v1725_v46 = vpop.permute.xlu0 %1724 }
0x1e4e   :  { %1727 = vst.msk [vmem:[#allocation4] sm:$0xff] %vm126_vm0, %v1725_v46 }
0x1e55   :  { %v1801_v3 = vld [vmem:[#allocation4] sm:$0xff] }
0x1e56   :  { %1808 = vrot.lane.b32.xlu0 %v1801_v3, %s2518_s27 }
0x1e5a   :  { %1883 = vrot.lane.b32.xlu0 %v1881_v14, %s2518_s27 }
0x1ec8   :  { %v1809_v58 = vpop.permute.xlu0 %1808 }
0x1ec9   :  { %v1811_v4 = vsel %vm1806_vm14, %v1799_v62, %v1809_v58 }
0x1eca   :  { %1813 = vrot.lane.b32.xlu1 %v1811_v4, %s2518_s27 }
0x1ecc   :  { %v1884_v33 = vpop.permute.xlu0 %1883 }
0x1ecd   :  { %v1886_v57 = vadd.f32 %v1884_v33, %v1880_v26 }
0x1ece   :  { %1893 = vperm.xlu1 %2306, %v1891_v30  }
0x1ecf   :  { %2425 = vtanh.f32 %v1886_v57 }
0x1ed9   :  { %v2426_v40 = vpop.eup %2425 }
0x1eda   :  { %v1888_v42 = vmul.f32 %v2426_v40, %v2424_v38 }
0x1f3c   :  { %v1814_v7 = vpop.permute.xlu1 %1813 }
0x1f3d   :  { %1816 = vst.msk [vmem:[#allocation4] sm:$0xff] %vm126_vm0, %v1814_v7 }
0x1f44   :  { %v1890_v19 = vld [vmem:[#allocation4] sm:$0xff] }
0x1f45   :  { %1897 = vrot.lane.b32.xlu0 %v1890_v19, %s2518_s27 }
0x1f4d   :  { %v1894_v31 = vpop.permute.xlu1 %1893 }
0x1f4e   :  { %vm1895_vm2 = vcmp.eq.s32.totalorder %v1894_v31, 1 }
0x1fb7   :  { %v1898_v35 = vpop.permute.xlu0 %1897 }
0x1fb8   :  { %v1900_v36 = vsel %vm1895_vm2, %v1888_v42, %v1898_v35 }
0x1fb9   :  { %1902 = vrot.lane.b32.xlu1 %v1900_v36, %s2518_s27 }
0x202b   :  { %v1903_v18 = vpop.permute.xlu1 %1902 }
0x202c   :  { %1905 = vst.msk [vmem:[#allocation4] sm:$0xff] %vm126_vm0, %v1903_v18 }
0x2033   :  { %v1906_v34 = vld [vmem:[#allocation4] sm:$0xff] }
0x2034   :  { %2149 = vmatmul.mubr.msk.f32.vlgmr.msra.gmra.mrb[28].mxu0 %vm126_vm0, %v1906_v34 }
0x2107   :  { %v1991_v29 = vpop.f32.mrb[28].mxu0 }
0x2108   :  { %v1992_v23 = vadd.f32 %v2118_v8, %v1991_v29  ;;  %v2150_v62 = vpop.f32.mrb[29].mxu0 }
0x210a   :  { %1996 = vst.msk [vmem:[%s3164_s7] sm:$0xff] %vm1995_vm3, %v1992_v23 }
0x210b   :  { %2001 = vsyncpa [#allocation7], 1 }
0x210c   :  { %2002 = vsyncpa [#allocation9], 1 }
0x210d   :  { %2003 = vsyncmov [#allocation5] }
0x2110   :  { %s2004_s9 = vpop.sfrf %2003 }
0x2111   :  { %p2120_p11 = scmp.ne.s32.totalorder %s2004_s9, 0 }
0x2113   :  { %2008 = shalt.err (%p2120_p11)  }

</bundles_post_ra>
